<compile_context>
chip_gen: v7x
topology: tpu7x:2x2x1
jax: 0.10.0
libtpu: 0.0.40
codegen_flags: <defaults>
</compile_context>

<pallas_src>
import math

import jax
import jax.numpy as jnp
from jax.experimental import pallas as pl
from jax.experimental.pallas import tpu as pltpu

# --- module hyper-parameters (defaults of the PyTorch MLP) -------------------
NET_DEPTH = 8
NET_WIDTH = 256
NET_DEPTH_COND = 1          # kernel below hard-codes this default
NET_WIDTH_COND = 128
SKIP_LAYER = 4
INPUT_DIM = 60
CONDITION_DIM = 27
NUM_RGB = 3
NUM_SIGMA = 1
OUT_WIDTH = 128             # packed lane-dense head: [:, :3]=rgb, [:, 3]=sigma
assert NET_DEPTH_COND == 1


def _round_up(x, m):
    return ((x + m - 1) // m) * m


def _bf16_elementwise_ok():
    """v6e / v7x have a bf16 VPU; v5e-class and older chips do not."""
    try:
        kind = jax.devices()[0].device_kind.lower()
    except Exception:
        return True
    return not any(t in kind for t in ("v2", "v3", "v4", "v5"))


# --- deterministic parameter init (xavier_uniform weights, zero bias) --------
def init_params(key):
    """Returns (kparams, rparams).

    kparams: dict of kernel-ready packed params (bf16 weights, f32 biases,
             concat-free splits, packed 128-wide head).
    rparams: dict of original-shape f32 weights for the pure-JAX reference.
    """
    def xavier(k, shape):
        fan_in, fan_out = shape
        bound = (6.0 / (fan_in + fan_out)) ** 0.5
        return jax.random.uniform(k, shape, jnp.float32, -bound, bound)

    keys = iter(jax.random.split(key, 16))

    trunk_w, trunk_b = [], []
    in_f = INPUT_DIM
    for i in range(NET_DEPTH):
        trunk_w.append(xavier(next(keys), (in_f, NET_WIDTH)))
        trunk_b.append(jnp.zeros((1, NET_WIDTH), jnp.float32))
        if i % SKIP_LAYER == 0 and i > 0:
            in_f = NET_WIDTH + INPUT_DIM
        else:
            in_f = NET_WIDTH
    hidden = in_f  # 256

    w_sigma = xavier(next(keys), (hidden, NUM_SIGMA))
    b_sigma = jnp.zeros((1, NUM_SIGMA), jnp.float32)
    w_bneck = xavier(next(keys), (hidden, NET_WIDTH))
    b_bneck = jnp.zeros((1, NET_WIDTH), jnp.float32)

    cond_w, cond_b = [], []
    in_f = NET_WIDTH + CONDITION_DIM
    for _ in range(NET_DEPTH_COND):
        cond_w.append(xavier(next(keys), (in_f, NET_WIDTH_COND)))
        cond_b.append(jnp.zeros((1, NET_WIDTH_COND), jnp.float32))
        in_f = NET_WIDTH_COND

    w_rgb = xavier(next(keys), (in_f, NUM_RGB))
    b_rgb = jnp.zeros((1, NUM_RGB), jnp.float32)

    rparams = dict(trunk_w=trunk_w, trunk_b=trunk_b,
                   w_sigma=w_sigma, b_sigma=b_sigma,
                   w_bneck=w_bneck, b_bneck=b_bneck,
                   cond_w=cond_w, cond_b=cond_b,
                   w_rgb=w_rgb, b_rgb=b_rgb)

    bf = lambda w: w.astype(jnp.bfloat16)

    # layer 5 consumes the skip concat [h(256), x(60)] -> split its weight.
    w5a = trunk_w[5][:NET_WIDTH]     # [256, 256]
    w5b = trunk_w[5][NET_WIDTH:]     # [60, 256]

    # packed "input-width" weights: row 0 = layer-0 weight, row 1 = w5b
    w_in = jnp.stack([bf(trunk_w[0]), bf(w5b)])                        # [2,60,256]
    # packed square weights: w1..w4, w5a, w6, w7, bottleneck
    sq = [trunk_w[1], trunk_w[2], trunk_w[3], trunk_w[4],
          w5a, trunk_w[6], trunk_w[7], w_bneck]
    w_sq = jnp.stack([bf(w) for w in sq])                              # [8,256,256]
    # packed biases: b0..b7, bottleneck bias
    b_sq = jnp.concatenate([b.reshape(1, NET_WIDTH) for b in trunk_b]
                           + [b_bneck.reshape(1, NET_WIDTH)], axis=0)  # [9,256] f32

    # condition layer split (concat-free): concat([bneck, c]) @ Wc
    wc, bc = cond_w[0], cond_b[0]
    wca = bf(wc[:NET_WIDTH])        # [256, 128]
    wcb = bf(wc[NET_WIDTH:])        # [27, 128]  (consumed by the wrapper)

    # packed lane-dense head: columns [0:3] <- rgb, column [3] <- sigma
    wh_h = jnp.zeros((NET_WIDTH_COND, OUT_WIDTH), jnp.float32)
    wh_h = wh_h.at[:, :NUM_RGB].set(w_rgb)
    wh_f = jnp.zeros((hidden, OUT_WIDTH), jnp.float32)
    wh_f = wh_f.at[:, NUM_RGB:NUM_RGB + NUM_SIGMA].set(w_sigma)
    bh = jnp.zeros((1, OUT_WIDTH), jnp.float32)
    bh = bh.at[:, :NUM_RGB].set(b_rgb[0])
    bh = bh.at[:, NUM_RGB:NUM_RGB + NUM_SIGMA].set(b_sigma[0])

    kparams = dict(w_in=w_in, w_sq=w_sq, b_sq=b_sq,
                   wca=wca, wcb=wcb, bc=bc,
                   whh=bf(wh_h), whf=bf(wh_f), bh=bh)
    return kparams, rparams


# --- Pallas kernel ------------------------------------------------------------
def make_mlp_kernel(use_bf16_ew: bool):
    f32, bf16 = jnp.float32, jnp.bfloat16

    def kernel(x_ref, cvec_ref,
               w_in_ref, w_sq_ref, b_ref,
               wca_ref, whh_ref, whf_ref, bh_ref,
               out_ref):
        x16 = x_ref[0].astype(bf16)                       # [tm, 60]

        def dot_f32(a16, w16):
            # bf16 x bf16 -> f32 accumulation on the MXU
            return jnp.dot(a16, w16, preferred_element_type=f32)

        def bias(k):
            row = b_ref[k].reshape(1, NET_WIDTH)          # [1, 256] f32
            return row.astype(bf16) if use_bf16_ew else row

        def act(acc_f32, k):
            # bias add + ReLU; on bf16-VPU chips do it packed (2/lane) in bf16,
            # otherwise in f32 (v5e).  Either way the next MXU input is bf16.
            if use_bf16_ew:
                return jnp.maximum(acc_f32.astype(bf16) + bias(k), 0)
            return jnp.maximum(acc_f32 + bias(k), 0.0).astype(bf16)

        # trunk (8 dense + ReLU); layer 5 consumes the skip connection,
        # expressed concat-free as  h @ w5a + x @ w5b.
        h = act(dot_f32(x16, w_in_ref[0]), 0)
        h = act(dot_f32(h, w_sq_ref[0]), 1)
        h = act(dot_f32(h, w_sq_ref[1]), 2)
        h = act(dot_f32(h, w_sq_ref[2]), 3)
        h = act(dot_f32(h, w_sq_ref[3]), 4)
        h = act(dot_f32(h, w_sq_ref[4]) + dot_f32(x16, w_in_ref[1]), 5)
        h = act(dot_f32(h, w_sq_ref[5]), 6)
        feat16 = act(dot_f32(h, w_sq_ref[6]), 7)          # [tm, 256] bf16

        # bottleneck (no activation)
        bn_acc = dot_f32(feat16, w_sq_ref[7])
        if use_bf16_ew:
            bneck16 = bn_acc.astype(bf16) + bias(8)
        else:
            bneck16 = (bn_acc + bias(8)).astype(bf16)

        # condition layer, concat-free; the condition term + condition bias was
        # hoisted to the wrapper:  cvec = cond_view @ Wc_b + b_c   [1, 128] f32
        cvec = cvec_ref[0]
        g_acc = dot_f32(bneck16, wca_ref[...])
        if use_bf16_ew:
            g16 = jnp.maximum(g_acc.astype(bf16) + cvec.astype(bf16), 0)
        else:
            g16 = jnp.maximum(g_acc + cvec, 0.0).astype(bf16)

        # packed head: out[:, :3] = rgb = g @ W_rgb, out[:, 3] = sigma = feat @ W_sigma
        out = (dot_f32(g16, whh_ref[...]) + dot_f32(feat16, whf_ref[...])
               + bh_ref[...])                              # [tm, 128] f32
        out_ref[0] = out.astype(out_ref.dtype)             # lane-dense bf16 store

    return kernel


# --- wrapper ------------------------------------------------------------------
def mlp_forward(samples, cond_view, kparams, tm=1024):
    """samples: [B, ..., INPUT_DIM] f32, cond_view: [B, CONDITION_DIM] f32."""
    batch_shape = samples.shape[:-1]
    B = batch_shape[0]
    rows = int(math.prod(batch_shape[1:]))

    x = samples.reshape(B, rows, INPUT_DIM).astype(jnp.float32)

    # Hoisted per-batch condition contribution + condition-layer bias: [B,1,128]
    c = cond_view.reshape(B, CONDITION_DIM).astype(jnp.float32)
    cvec = (jnp.dot(c.astype(jnp.bfloat16), kparams["wcb"],
                    preferred_element_type=jnp.float32)
            + kparams["bc"]).reshape(B, 1, NET_WIDTH_COND)

    # Balanced row tiles (avoid one near-empty padded tile on awkward counts).
    tm = max(8, tm - (tm % 8))
    num_tiles = -(-rows // tm)
    tm_eff = _round_up(-(-rows // num_tiles), 8)
    r_pad = tm_eff * num_tiles
    if r_pad != rows:
        x = jnp.pad(x, ((0, 0), (0, r_pad - rows), (0, 0)))

    grid = (B, num_tiles)

    weights = [kparams["w_in"], kparams["w_sq"], kparams["b_sq"],
               kparams["wca"], kparams["whh"], kparams["whf"], kparams["bh"]]
    # Grid-invariant block indices -> weights stay resident in VMEM across steps.
    # TODO(synk): pipeline_mode=pl.Buffered(1) on these specs would reclaim the
    # ~1.3 MB of double-buffering; kept default for compile robustness.
    param_specs = [pl.BlockSpec(p.shape, lambda b, i, nd=p.ndim: (0,) * nd)
                   for p in weights]

    kernel = make_mlp_kernel(_bf16_elementwise_ok())

    out = pl.pallas_call(
        kernel,
        out_shape=jax.ShapeDtypeStruct((B, r_pad, OUT_WIDTH), jnp.bfloat16),
        grid_spec=pltpu.PrefetchScalarGridSpec(
            num_scalar_prefetch=0,
            grid=grid,
            in_specs=[pl.BlockSpec((1, tm_eff, INPUT_DIM), lambda b, i: (b, i, 0)),
                      pl.BlockSpec((1, 1, NET_WIDTH_COND), lambda b, i: (b, 0, 0))]
                     + param_specs,
            out_specs=pl.BlockSpec((1, tm_eff, OUT_WIDTH), lambda b, i: (b, i, 0)),
        ),
        compiler_params=pltpu.CompilerParams(
            dimension_semantics=("parallel", "parallel"),
            vmem_limit_bytes=48 * 1024 * 1024),
    )(x, cvec, *weights)

    out = out[:, :rows].astype(jnp.float32)                # drop padded rows
    raw_rgb = out[..., :NUM_RGB].reshape(batch_shape + (NUM_RGB,))
    raw_sigma = out[..., NUM_RGB:NUM_RGB + NUM_SIGMA].reshape(batch_shape + (NUM_SIGMA,))
    return raw_rgb, raw_sigma


# --- pure-JAX reference (same bf16 matmul precision, original formulation) ----
def mlp_forward_ref(samples, cond_view, rparams):
    batch_shape = samples.shape[:-1]
    x = samples.reshape(-1, INPUT_DIM).astype(jnp.float32)
    c = cond_view.reshape((batch_shape[0],) + (1,) * (len(batch_shape) - 1)
                          + (CONDITION_DIM,))
    c = jnp.broadcast_to(c, batch_shape + (CONDITION_DIM,))
    c = c.reshape(-1, CONDITION_DIM).astype(jnp.float32)

    def dense(v, w, b):
        return jnp.dot(v.astype(jnp.bfloat16), w.astype(jnp.bfloat16),
                       preferred_element_type=jnp.float32) + b

    inputs = x
    h = x
    for i in range(NET_DEPTH):
        h = jnp.maximum(dense(h, rparams["trunk_w"][i], rparams["trunk_b"][i]), 0.0)
        if i % SKIP_LAYER == 0 and i > 0:
            h = jnp.concatenate([h, inputs], axis=-1)
    feat = h
    sigma = dense(feat, rparams["w_sigma"], rparams["b_sigma"])
    bneck = dense(feat, rparams["w_bneck"], rparams["b_bneck"])
    g = jnp.concatenate([bneck, c], axis=-1)
    for j in range(NET_DEPTH_COND):
        g = jnp.maximum(dense(g, rparams["cond_w"][j], rparams["cond_b"][j]), 0.0)
    rgb = dense(g, rparams["w_rgb"], rparams["b_rgb"])
    return (rgb.reshape(batch_shape + (NUM_RGB,)),
            sigma.reshape(batch_shape + (NUM_SIGMA,)))


if __name__ == "__main__":
    key = jax.random.PRNGKey(0)
    k_param, k_x, k_c = jax.random.split(key, 3)

    kparams, rparams = init_params(k_param)

    # small shapes: samples [B=2, R=4, S=16, 60], cond_view [B=2, 27]
    samples = jax.random.normal(k_x, (2, 4, 16, INPUT_DIM), jnp.float32)
    cond_view = jax.random.normal(k_c, (2, CONDITION_DIM), jnp.float32)

    raw_rgb, raw_sigma = mlp_forward(samples, cond_view, kparams)
    jax.block_until_ready((raw_rgb, raw_sigma))

    ref_rgb, ref_sigma = mlp_forward_ref(samples, cond_view, rparams)
    assert raw_rgb.shape == (2, 4, 16, 3) and raw_sigma.shape == (2, 4, 16, 1)
    assert jnp.allclose(raw_rgb, ref_rgb, atol=1e-2, rtol=1e-2), \
        float(jnp.max(jnp.abs(raw_rgb - ref_rgb)))
    assert jnp.allclose(raw_sigma, ref_sigma, atol=1e-2, rtol=1e-2), \
        float(jnp.max(jnp.abs(raw_sigma - ref_sigma)))

    print("KERNEL_OK")
</pallas_src>

<mosaic_0001>
module attributes {stable_mosaic.version = 11 : i64} {
  func.func @kernel(%arg0: i32, %arg1: i32, %arg2: memref<1x64x60xf32, #tpu.memory_space<vmem>>, %arg3: memref<1x1x128xf32, #tpu.memory_space<vmem>>, %arg4: memref<2x60x256xbf16, #tpu.memory_space<vmem>>, %arg5: memref<8x256x256xbf16, #tpu.memory_space<vmem>>, %arg6: memref<9x256xf32, #tpu.memory_space<vmem>>, %arg7: memref<256x128xbf16, #tpu.memory_space<vmem>>, %arg8: memref<128x128xbf16, #tpu.memory_space<vmem>>, %arg9: memref<256x128xbf16, #tpu.memory_space<vmem>>, %arg10: memref<1x128xf32, #tpu.memory_space<vmem>>, %arg11: memref<1x64x128xbf16, #tpu.memory_space<vmem>>) attributes {dimension_semantics = [#tpu.dimension_semantics<parallel>, #tpu.dimension_semantics<parallel>], iteration_bounds = array<i64: 2, 1>, scalar_prefetch = 0 : i64, scratch_operands = 0 : i64, tpu.core_type = #tpu.core_type<tc>, window_params = [{transform_indices = @transform_0, window_bounds = array<i64: 1, 64, 60>}, {transform_indices = @transform_1, window_bounds = array<i64: 1, 1, 128>}, {pipeline_mode = #tpu.pipeline_mode<synchronous>, transform_indices = @transform_2, window_bounds = array<i64: 2, 60, 256>}, {pipeline_mode = #tpu.pipeline_mode<synchronous>, transform_indices = @transform_3, window_bounds = array<i64: 8, 256, 256>}, {pipeline_mode = #tpu.pipeline_mode<synchronous>, transform_indices = @transform_4, window_bounds = array<i64: 9, 256>}, {pipeline_mode = #tpu.pipeline_mode<synchronous>, transform_indices = @transform_5, window_bounds = array<i64: 256, 128>}, {pipeline_mode = #tpu.pipeline_mode<synchronous>, transform_indices = @transform_6, window_bounds = array<i64: 128, 128>}, {pipeline_mode = #tpu.pipeline_mode<synchronous>, transform_indices = @transform_7, window_bounds = array<i64: 256, 128>}, {pipeline_mode = #tpu.pipeline_mode<synchronous>, transform_indices = @transform_8, window_bounds = array<i64: 1, 128>}, {transform_indices = @transform_9, window_bounds = array<i64: 1, 64, 128>}]} {
    %c0 = arith.constant 0 : index
    %c0_0 = arith.constant 0 : index
    %c0_1 = arith.constant 0 : index
    %0 = vector.load %arg2[%c0, %c0_0, %c0_1] : memref<1x64x60xf32, #tpu.memory_space<vmem>>, vector<1x64x60xf32>
    %1 = vector.shape_cast %0 : vector<1x64x60xf32> to vector<64x60xf32>
    %2 = arith.truncf %1 : vector<64x60xf32> to vector<64x60xbf16>
    %c0_2 = arith.constant 0 : index
    %c0_3 = arith.constant 0 : index
    %c0_4 = arith.constant 0 : index
    %3 = vector.load %arg4[%c0_2, %c0_3, %c0_4] : memref<2x60x256xbf16, #tpu.memory_space<vmem>>, vector<1x60x256xbf16>
    %4 = vector.shape_cast %3 : vector<1x60x256xbf16> to vector<60x256xbf16>
    %cst = arith.constant dense<0.000000e+00> : vector<64x256xf32>
    %5 = tpu.matmul %2, %4, %cst {dimension_numbers = #tpu.dot_dimension_numbers<[1], [0], [0], [1], [0, 0, 1, 1], [], []>} : vector<64x60xbf16>, vector<60x256xbf16>, vector<64x256xf32> -> vector<64x256xf32>
    %6 = arith.truncf %5 : vector<64x256xf32> to vector<64x256xbf16>
    %c0_5 = arith.constant 0 : index
    %c0_6 = arith.constant 0 : index
    %7 = vector.load %arg6[%c0_5, %c0_6] : memref<9x256xf32, #tpu.memory_space<vmem>>, vector<1x256xf32>
    %8 = vector.shape_cast %7 : vector<1x256xf32> to vector<256xf32>
    %9 = vector.shape_cast %8 : vector<256xf32> to vector<1x256xf32>
    %10 = arith.truncf %9 : vector<1x256xf32> to vector<1x256xbf16>
    %11 = vector.broadcast %10 : vector<1x256xbf16> to vector<64x256xbf16>
    %12 = arith.addf %6, %11 : vector<64x256xbf16>
    %cst_7 = arith.constant 0.000000e+00 : bf16
    %13 = vector.broadcast %cst_7 : bf16 to vector<64x256xbf16>
    %14 = arith.maximumf %12, %13 : vector<64x256xbf16>
    %c0_8 = arith.constant 0 : index
    %c0_9 = arith.constant 0 : index
    %c0_10 = arith.constant 0 : index
    %15 = vector.load %arg5[%c0_8, %c0_9, %c0_10] : memref<8x256x256xbf16, #tpu.memory_space<vmem>>, vector<1x256x256xbf16>
    %16 = vector.shape_cast %15 : vector<1x256x256xbf16> to vector<256x256xbf16>
    %cst_11 = arith.constant dense<0.000000e+00> : vector<64x256xf32>
    %17 = tpu.matmul %14, %16, %cst_11 {dimension_numbers = #tpu.dot_dimension_numbers<[1], [0], [0], [1], [0, 0, 1, 1], [], []>} : vector<64x256xbf16>, vector<256x256xbf16>, vector<64x256xf32> -> vector<64x256xf32>
    %18 = arith.truncf %17 : vector<64x256xf32> to vector<64x256xbf16>
    %c1 = arith.constant 1 : index
    %c0_12 = arith.constant 0 : index
    %19 = vector.load %arg6[%c1, %c0_12] : memref<9x256xf32, #tpu.memory_space<vmem>>, vector<1x256xf32>
    %20 = vector.shape_cast %19 : vector<1x256xf32> to vector<256xf32>
    %21 = vector.shape_cast %20 : vector<256xf32> to vector<1x256xf32>
    %22 = arith.truncf %21 : vector<1x256xf32> to vector<1x256xbf16>
    %23 = vector.broadcast %22 : vector<1x256xbf16> to vector<64x256xbf16>
    %24 = arith.addf %18, %23 : vector<64x256xbf16>
    %cst_13 = arith.constant 0.000000e+00 : bf16
    %25 = vector.broadcast %cst_13 : bf16 to vector<64x256xbf16>
    %26 = arith.maximumf %24, %25 : vector<64x256xbf16>
    %c1_14 = arith.constant 1 : index
    %c0_15 = arith.constant 0 : index
    %c0_16 = arith.constant 0 : index
    %27 = vector.load %arg5[%c1_14, %c0_15, %c0_16] : memref<8x256x256xbf16, #tpu.memory_space<vmem>>, vector<1x256x256xbf16>
    %28 = vector.shape_cast %27 : vector<1x256x256xbf16> to vector<256x256xbf16>
    %cst_17 = arith.constant dense<0.000000e+00> : vector<64x256xf32>
    %29 = tpu.matmul %26, %28, %cst_17 {dimension_numbers = #tpu.dot_dimension_numbers<[1], [0], [0], [1], [0, 0, 1, 1], [], []>} : vector<64x256xbf16>, vector<256x256xbf16>, vector<64x256xf32> -> vector<64x256xf32>
    %30 = arith.truncf %29 : vector<64x256xf32> to vector<64x256xbf16>
    %c2 = arith.constant 2 : index
    %c0_18 = arith.constant 0 : index
    %31 = vector.load %arg6[%c2, %c0_18] : memref<9x256xf32, #tpu.memory_space<vmem>>, vector<1x256xf32>
    %32 = vector.shape_cast %31 : vector<1x256xf32> to vector<256xf32>
    %33 = vector.shape_cast %32 : vector<256xf32> to vector<1x256xf32>
    %34 = arith.truncf %33 : vector<1x256xf32> to vector<1x256xbf16>
    %35 = vector.broadcast %34 : vector<1x256xbf16> to vector<64x256xbf16>
    %36 = arith.addf %30, %35 : vector<64x256xbf16>
    %cst_19 = arith.constant 0.000000e+00 : bf16
    %37 = vector.broadcast %cst_19 : bf16 to vector<64x256xbf16>
    %38 = arith.maximumf %36, %37 : vector<64x256xbf16>
    %c2_20 = arith.constant 2 : index
    %c0_21 = arith.constant 0 : index
    %c0_22 = arith.constant 0 : index
    %39 = vector.load %arg5[%c2_20, %c0_21, %c0_22] : memref<8x256x256xbf16, #tpu.memory_space<vmem>>, vector<1x256x256xbf16>
    %40 = vector.shape_cast %39 : vector<1x256x256xbf16> to vector<256x256xbf16>
    %cst_23 = arith.constant dense<0.000000e+00> : vector<64x256xf32>
    %41 = tpu.matmul %38, %40, %cst_23 {dimension_numbers = #tpu.dot_dimension_numbers<[1], [0], [0], [1], [0, 0, 1, 1], [], []>} : vector<64x256xbf16>, vector<256x256xbf16>, vector<64x256xf32> -> vector<64x256xf32>
    %42 = arith.truncf %41 : vector<64x256xf32> to vector<64x256xbf16>
    %c3 = arith.constant 3 : index
    %c0_24 = arith.constant 0 : index
    %43 = vector.load %arg6[%c3, %c0_24] : memref<9x256xf32, #tpu.memory_space<vmem>>, vector<1x256xf32>
    %44 = vector.shape_cast %43 : vector<1x256xf32> to vector<256xf32>
    %45 = vector.shape_cast %44 : vector<256xf32> to vector<1x256xf32>
    %46 = arith.truncf %45 : vector<1x256xf32> to vector<1x256xbf16>
    %47 = vector.broadcast %46 : vector<1x256xbf16> to vector<64x256xbf16>
    %48 = arith.addf %42, %47 : vector<64x256xbf16>
    %cst_25 = arith.constant 0.000000e+00 : bf16
    %49 = vector.broadcast %cst_25 : bf16 to vector<64x256xbf16>
    %50 = arith.maximumf %48, %49 : vector<64x256xbf16>
    %c3_26 = arith.constant 3 : index
    %c0_27 = arith.constant 0 : index
    %c0_28 = arith.constant 0 : index
    %51 = vector.load %arg5[%c3_26, %c0_27, %c0_28] : memref<8x256x256xbf16, #tpu.memory_space<vmem>>, vector<1x256x256xbf16>
    %52 = vector.shape_cast %51 : vector<1x256x256xbf16> to vector<256x256xbf16>
    %cst_29 = arith.constant dense<0.000000e+00> : vector<64x256xf32>
    %53 = tpu.matmul %50, %52, %cst_29 {dimension_numbers = #tpu.dot_dimension_numbers<[1], [0], [0], [1], [0, 0, 1, 1], [], []>} : vector<64x256xbf16>, vector<256x256xbf16>, vector<64x256xf32> -> vector<64x256xf32>
    %54 = arith.truncf %53 : vector<64x256xf32> to vector<64x256xbf16>
    %c4 = arith.constant 4 : index
    %c0_30 = arith.constant 0 : index
    %55 = vector.load %arg6[%c4, %c0_30] : memref<9x256xf32, #tpu.memory_space<vmem>>, vector<1x256xf32>
    %56 = vector.shape_cast %55 : vector<1x256xf32> to vector<256xf32>
    %57 = vector.shape_cast %56 : vector<256xf32> to vector<1x256xf32>
    %58 = arith.truncf %57 : vector<1x256xf32> to vector<1x256xbf16>
    %59 = vector.broadcast %58 : vector<1x256xbf16> to vector<64x256xbf16>
    %60 = arith.addf %54, %59 : vector<64x256xbf16>
    %cst_31 = arith.constant 0.000000e+00 : bf16
    %61 = vector.broadcast %cst_31 : bf16 to vector<64x256xbf16>
    %62 = arith.maximumf %60, %61 : vector<64x256xbf16>
    %c4_32 = arith.constant 4 : index
    %c0_33 = arith.constant 0 : index
    %c0_34 = arith.constant 0 : index
    %63 = vector.load %arg5[%c4_32, %c0_33, %c0_34] : memref<8x256x256xbf16, #tpu.memory_space<vmem>>, vector<1x256x256xbf16>
    %64 = vector.shape_cast %63 : vector<1x256x256xbf16> to vector<256x256xbf16>
    %cst_35 = arith.constant dense<0.000000e+00> : vector<64x256xf32>
    %65 = tpu.matmul %62, %64, %cst_35 {dimension_numbers = #tpu.dot_dimension_numbers<[1], [0], [0], [1], [0, 0, 1, 1], [], []>} : vector<64x256xbf16>, vector<256x256xbf16>, vector<64x256xf32> -> vector<64x256xf32>
    %c1_36 = arith.constant 1 : index
    %c0_37 = arith.constant 0 : index
    %c0_38 = arith.constant 0 : index
    %66 = vector.load %arg4[%c1_36, %c0_37, %c0_38] : memref<2x60x256xbf16, #tpu.memory_space<vmem>>, vector<1x60x256xbf16>
    %67 = vector.shape_cast %66 : vector<1x60x256xbf16> to vector<60x256xbf16>
    %cst_39 = arith.constant dense<0.000000e+00> : vector<64x256xf32>
    %68 = tpu.matmul %2, %67, %cst_39 {dimension_numbers = #tpu.dot_dimension_numbers<[1], [0], [0], [1], [0, 0, 1, 1], [], []>} : vector<64x60xbf16>, vector<60x256xbf16>, vector<64x256xf32> -> vector<64x256xf32>
    %69 = arith.addf %65, %68 : vector<64x256xf32>
    %70 = arith.truncf %69 : vector<64x256xf32> to vector<64x256xbf16>
    %c5 = arith.constant 5 : index
    %c0_40 = arith.constant 0 : index
    %71 = vector.load %arg6[%c5, %c0_40] : memref<9x256xf32, #tpu.memory_space<vmem>>, vector<1x256xf32>
    %72 = vector.shape_cast %71 : vector<1x256xf32> to vector<256xf32>
    %73 = vector.shape_cast %72 : vector<256xf32> to vector<1x256xf32>
    %74 = arith.truncf %73 : vector<1x256xf32> to vector<1x256xbf16>
    %75 = vector.broadcast %74 : vector<1x256xbf16> to vector<64x256xbf16>
    %76 = arith.addf %70, %75 : vector<64x256xbf16>
    %cst_41 = arith.constant 0.000000e+00 : bf16
    %77 = vector.broadcast %cst_41 : bf16 to vector<64x256xbf16>
    %78 = arith.maximumf %76, %77 : vector<64x256xbf16>
    %c5_42 = arith.constant 5 : index
    %c0_43 = arith.constant 0 : index
    %c0_44 = arith.constant 0 : index
    %79 = vector.load %arg5[%c5_42, %c0_43, %c0_44] : memref<8x256x256xbf16, #tpu.memory_space<vmem>>, vector<1x256x256xbf16>
    %80 = vector.shape_cast %79 : vector<1x256x256xbf16> to vector<256x256xbf16>
    %cst_45 = arith.constant dense<0.000000e+00> : vector<64x256xf32>
    %81 = tpu.matmul %78, %80, %cst_45 {dimension_numbers = #tpu.dot_dimension_numbers<[1], [0], [0], [1], [0, 0, 1, 1], [], []>} : vector<64x256xbf16>, vector<256x256xbf16>, vector<64x256xf32> -> vector<64x256xf32>
    %82 = arith.truncf %81 : vector<64x256xf32> to vector<64x256xbf16>
    %c6 = arith.constant 6 : index
    %c0_46 = arith.constant 0 : index
    %83 = vector.load %arg6[%c6, %c0_46] : memref<9x256xf32, #tpu.memory_space<vmem>>, vector<1x256xf32>
    %84 = vector.shape_cast %83 : vector<1x256xf32> to vector<256xf32>
    %85 = vector.shape_cast %84 : vector<256xf32> to vector<1x256xf32>
    %86 = arith.truncf %85 : vector<1x256xf32> to vector<1x256xbf16>
    %87 = vector.broadcast %86 : vector<1x256xbf16> to vector<64x256xbf16>
    %88 = arith.addf %82, %87 : vector<64x256xbf16>
    %cst_47 = arith.constant 0.000000e+00 : bf16
    %89 = vector.broadcast %cst_47 : bf16 to vector<64x256xbf16>
    %90 = arith.maximumf %88, %89 : vector<64x256xbf16>
    %c6_48 = arith.constant 6 : index
    %c0_49 = arith.constant 0 : index
    %c0_50 = arith.constant 0 : index
    %91 = vector.load %arg5[%c6_48, %c0_49, %c0_50] : memref<8x256x256xbf16, #tpu.memory_space<vmem>>, vector<1x256x256xbf16>
    %92 = vector.shape_cast %91 : vector<1x256x256xbf16> to vector<256x256xbf16>
    %cst_51 = arith.constant dense<0.000000e+00> : vector<64x256xf32>
    %93 = tpu.matmul %90, %92, %cst_51 {dimension_numbers = #tpu.dot_dimension_numbers<[1], [0], [0], [1], [0, 0, 1, 1], [], []>} : vector<64x256xbf16>, vector<256x256xbf16>, vector<64x256xf32> -> vector<64x256xf32>
    %94 = arith.truncf %93 : vector<64x256xf32> to vector<64x256xbf16>
    %c7 = arith.constant 7 : index
    %c0_52 = arith.constant 0 : index
    %95 = vector.load %arg6[%c7, %c0_52] : memref<9x256xf32, #tpu.memory_space<vmem>>, vector<1x256xf32>
    %96 = vector.shape_cast %95 : vector<1x256xf32> to vector<256xf32>
    %97 = vector.shape_cast %96 : vector<256xf32> to vector<1x256xf32>
    %98 = arith.truncf %97 : vector<1x256xf32> to vector<1x256xbf16>
    %99 = vector.broadcast %98 : vector<1x256xbf16> to vector<64x256xbf16>
    %100 = arith.addf %94, %99 : vector<64x256xbf16>
    %cst_53 = arith.constant 0.000000e+00 : bf16
    %101 = vector.broadcast %cst_53 : bf16 to vector<64x256xbf16>
    %102 = arith.maximumf %100, %101 : vector<64x256xbf16>
    %c7_54 = arith.constant 7 : index
    %c0_55 = arith.constant 0 : index
    %c0_56 = arith.constant 0 : index
    %103 = vector.load %arg5[%c7_54, %c0_55, %c0_56] : memref<8x256x256xbf16, #tpu.memory_space<vmem>>, vector<1x256x256xbf16>
    %104 = vector.shape_cast %103 : vector<1x256x256xbf16> to vector<256x256xbf16>
    %cst_57 = arith.constant dense<0.000000e+00> : vector<64x256xf32>
    %105 = tpu.matmul %102, %104, %cst_57 {dimension_numbers = #tpu.dot_dimension_numbers<[1], [0], [0], [1], [0, 0, 1, 1], [], []>} : vector<64x256xbf16>, vector<256x256xbf16>, vector<64x256xf32> -> vector<64x256xf32>
    %106 = arith.truncf %105 : vector<64x256xf32> to vector<64x256xbf16>
    %c8 = arith.constant 8 : index
    %c0_58 = arith.constant 0 : index
    %107 = vector.load %arg6[%c8, %c0_58] : memref<9x256xf32, #tpu.memory_space<vmem>>, vector<1x256xf32>
    %108 = vector.shape_cast %107 : vector<1x256xf32> to vector<256xf32>
    %109 = vector.shape_cast %108 : vector<256xf32> to vector<1x256xf32>
    %110 = arith.truncf %109 : vector<1x256xf32> to vector<1x256xbf16>
    %111 = vector.broadcast %110 : vector<1x256xbf16> to vector<64x256xbf16>
    %112 = arith.addf %106, %111 : vector<64x256xbf16>
    %c0_59 = arith.constant 0 : index
    %c0_60 = arith.constant 0 : index
    %c0_61 = arith.constant 0 : index
    %113 = vector.load %arg3[%c0_59, %c0_60, %c0_61] : memref<1x1x128xf32, #tpu.memory_space<vmem>>, vector<1x1x128xf32>
    %114 = vector.shape_cast %113 : vector<1x1x128xf32> to vector<1x128xf32>
    %c0_62 = arith.constant 0 : index
    %c0_63 = arith.constant 0 : index
    %115 = vector.load %arg7[%c0_62, %c0_63] : memref<256x128xbf16, #tpu.memory_space<vmem>>, vector<256x128xbf16>
    %cst_64 = arith.constant dense<0.000000e+00> : vector<64x128xf32>
    %116 = tpu.matmul %112, %115, %cst_64 {dimension_numbers = #tpu.dot_dimension_numbers<[1], [0], [0], [1], [0, 0, 1, 1], [], []>} : vector<64x256xbf16>, vector<256x128xbf16>, vector<64x128xf32> -> vector<64x128xf32>
    %117 = arith.truncf %116 : vector<64x128xf32> to vector<64x128xbf16>
    %118 = arith.truncf %114 : vector<1x128xf32> to vector<1x128xbf16>
    %119 = vector.broadcast %118 : vector<1x128xbf16> to vector<64x128xbf16>
    %120 = arith.addf %117, %119 : vector<64x128xbf16>
    %cst_65 = arith.constant 0.000000e+00 : bf16
    %121 = vector.broadcast %cst_65 : bf16 to vector<64x128xbf16>
    %122 = arith.maximumf %120, %121 : vector<64x128xbf16>
    %c0_66 = arith.constant 0 : index
    %c0_67 = arith.constant 0 : index
    %123 = vector.load %arg8[%c0_66, %c0_67] : memref<128x128xbf16, #tpu.memory_space<vmem>>, vector<128x128xbf16>
    %cst_68 = arith.constant dense<0.000000e+00> : vector<64x128xf32>
    %124 = tpu.matmul %122, %123, %cst_68 {dimension_numbers = #tpu.dot_dimension_numbers<[1], [0], [0], [1], [0, 0, 1, 1], [], []>} : vector<64x128xbf16>, vector<128x128xbf16>, vector<64x128xf32> -> vector<64x128xf32>
    %c0_69 = arith.constant 0 : index
    %c0_70 = arith.constant 0 : index
    %125 = vector.load %arg9[%c0_69, %c0_70] : memref<256x128xbf16, #tpu.memory_space<vmem>>, vector<256x128xbf16>
    %cst_71 = arith.constant dense<0.000000e+00> : vector<64x128xf32>
    %126 = tpu.matmul %102, %125, %cst_71 {dimension_numbers = #tpu.dot_dimension_numbers<[1], [0], [0], [1], [0, 0, 1, 1], [], []>} : vector<64x256xbf16>, vector<256x128xbf16>, vector<64x128xf32> -> vector<64x128xf32>
    %127 = arith.addf %124, %126 : vector<64x128xf32>
    %c0_72 = arith.constant 0 : index
    %c0_73 = arith.constant 0 : index
    %128 = vector.load %arg10[%c0_72, %c0_73] : memref<1x128xf32, #tpu.memory_space<vmem>>, vector<1x128xf32>
    %129 = vector.broadcast %128 : vector<1x128xf32> to vector<64x128xf32>
    %130 = arith.addf %127, %129 : vector<64x128xf32>
    %131 = arith.truncf %130 : vector<64x128xf32> to vector<64x128xbf16>
    %c0_74 = arith.constant 0 : index
    %c0_75 = arith.constant 0 : index
    %c0_76 = arith.constant 0 : index
    %132 = vector.load %arg11[%c0_74, %c0_75, %c0_76] : memref<1x64x128xbf16, #tpu.memory_space<vmem>>, vector<1x64x128xbf16>
    %133 = vector.shape_cast %132 : vector<1x64x128xbf16> to vector<64x128xbf16>
    %134 = vector.shape_cast %131 : vector<64x128xbf16> to vector<1x64x128xbf16>
    tpu.vector_store %arg11[%c0_74, %c0_75, %c0_76], %134 {strides = array<i32>} : memref<1x64x128xbf16, #tpu.memory_space<vmem>>, vector<1x64x128xbf16>,
    return
  }
  func.func @transform_0(%arg0: i32, %arg1: i32) -> (i32, i32, i32) {
    %c0_i32 = arith.constant 0 : i32
    %c0_i32_0 = arith.constant 0 : i32
    return %arg0, %arg1, %c0_i32 : i32, i32, i32
  }
  func.func @transform_1(%arg0: i32, %arg1: i32) -> (i32, i32, i32) {
    %c0_i32 = arith.constant 0 : i32
    %c0_i32_0 = arith.constant 0 : i32
    %c0_i32_1 = arith.constant 0 : i32
    return %arg0, %c0_i32, %c0_i32_0 : i32, i32, i32
  }
  func.func @transform_2(%arg0: i32, %arg1: i32) -> (i32, i32, i32) {
    %c0_i32 = arith.constant 0 : i32
    %c0_i32_0 = arith.constant 0 : i32
    %c0_i32_1 = arith.constant 0 : i32
    %c0_i32_2 = arith.constant 0 : i32
    return %c0_i32, %c0_i32_0, %c0_i32_1 : i32, i32, i32
  }
  func.func @transform_3(%arg0: i32, %arg1: i32) -> (i32, i32, i32) {
    %c0_i32 = arith.constant 0 : i32
    %c0_i32_0 = arith.constant 0 : i32
    %c0_i32_1 = arith.constant 0 : i32
    %c0_i32_2 = arith.constant 0 : i32
    return %c0_i32, %c0_i32_0, %c0_i32_1 : i32, i32, i32
  }
  func.func @transform_4(%arg0: i32, %arg1: i32) -> (i32, i32) {
    %c0_i32 = arith.constant 0 : i32
    %c0_i32_0 = arith.constant 0 : i32
    %c0_i32_1 = arith.constant 0 : i32
    return %c0_i32, %c0_i32_0 : i32, i32
  }
  func.func @transform_5(%arg0: i32, %arg1: i32) -> (i32, i32) {
    %c0_i32 = arith.constant 0 : i32
    %c0_i32_0 = arith.constant 0 : i32
    %c0_i32_1 = arith.constant 0 : i32
    return %c0_i32, %c0_i32_0 : i32, i32
  }
  func.func @transform_6(%arg0: i32, %arg1: i32) -> (i32, i32) {
    %c0_i32 = arith.constant 0 : i32
    %c0_i32_0 = arith.constant 0 : i32
    %c0_i32_1 = arith.constant 0 : i32
    return %c0_i32, %c0_i32_0 : i32, i32
  }
  func.func @transform_7(%arg0: i32, %arg1: i32) -> (i32, i32) {
    %c0_i32 = arith.constant 0 : i32
    %c0_i32_0 = arith.constant 0 : i32
    %c0_i32_1 = arith.constant 0 : i32
    return %c0_i32, %c0_i32_0 : i32, i32
  }
  func.func @transform_8(%arg0: i32, %arg1: i32) -> (i32, i32) {
    %c0_i32 = arith.constant 0 : i32
    %c0_i32_0 = arith.constant 0 : i32
    %c0_i32_1 = arith.constant 0 : i32
    return %c0_i32, %c0_i32_0 : i32, i32
  }
  func.func @transform_9(%arg0: i32, %arg1: i32) -> (i32, i32, i32) {
    %c0_i32 = arith.constant 0 : i32
    %c0_i32_0 = arith.constant 0 : i32
    return %arg0, %arg1, %c0_i32 : i32, i32, i32
  }
}

</mosaic_0001>

<bundles_post_ra>
// kernel: tpu_custom_call.1
= control target key start
LH: loop header
LB: loop body
LE: loop exit
PB: predicated region body
PF: predicated region fallthrough
CT: control target
= control target key end

     0   :  { %s5747_s0 = inlined_call_operand.vmem [shape: f32[2,64,60], index: 0, kind: input, shape index: {}]   ;;  %s5748_s1 = inlined_call_operand.vmem [shape: f32[2,1,128], index: 1, kind: input, shape index: {}]   ;;  %s5749_s2 = inlined_call_operand.vmem [shape: bf16[2,60,256], index: 2, kind: input, shape index: {}]   ;;  %s5750_s3 = inlined_call_operand.hbm [shape: bf16[8,256,256], index: 3, kind: input, shape index: {}]   ;;  %s5751_s4 = inlined_call_operand.vmem [shape: f32[9,256], index: 4, kind: input, shape index: {}]   ;;  %s5752_s5 = inlined_call_operand.vmem [shape: bf16[256,128], index: 5, kind: input, shape index: {}]   ;;  %s5753_s6 = inlined_call_operand.vmem [shape: bf16[128,128], index: 6, kind: input, shape index: {}]   ;;  %s5754_s7 = inlined_call_operand.vmem [shape: bf16[256,128], index: 7, kind: input, shape index: {}]   ;;  %s5755_s8 = inlined_call_operand.vmem [shape: f32[1,128], index: 8, kind: input, shape index: {}]   ;;  %s5756_s9 = inlined_call_operand.hbm [shape: bf16[2,64,128], index: 9, kind: output, shape index: {}]  }
   0x1   :  { %5762 = sst [smem:[#allocation9_spill]] %s5750_s3 }
   0x2   :  { %14 = vsyncpa [#allocation3], 0 }
   0x3   :  { %15 = vsyncpa [#allocation4], 0 }
   0x4   :  { %17 = vsyncpa [#allocation4 + $0x1], 0  ;;  %s5186_s30 = smov 0   ;;  %s5188_s10 = smov 0  }
   0x5   :  { %s5190_s11 = smov 0   ;;  %s5192_s12 = smov 0  }
   0x6   :  { %s5194_s13 = smov 0   ;;  %s5196_s14 = smov 0  }
   0x7 LB: > { %s3971_s15 = sadd.s32 4294967295, %s5127_s14   ;;  %s3972_s16 = sadd.s32 4294967294, %s5127_s14   ;;  %s5127_s14 = sphi %s5196_s14, %s23_s14   ;;  %s5123_s13 = sphi %s5194_s13, %s5779_s13   ;;  %s5119_s12 = sphi %s5192_s12, %s5778_s12   ;;  %s5115_s11 = sphi %s5190_s11, %s5777_s11   ;;  %s5111_s10 = sphi %s5188_s10, %s5776_s10   ;;  %s5107_s30 = sphi %s5186_s30, %s5775_s30  }
   0x8   : > { %s35_s17 = sadd.s32 1, %s5123_s13  ;;  %s245_s18 = sadd.s32 1, %s5115_s11 }
   0x9   : > { %p37_p0 = scmp.ge.s32.totalorder %s35_s17, 2  ;;  %p255_p1 = scmp.ne.s32.totalorder %s5115_s11, %s5111_s10 }
   0xa   : > { %p256_p2 = scmp.eq.s32.totalorder %s3971_s15, 1  ;;  %p261_p3 = scmp.ne.s32.totalorder %s5111_s10, %s5107_s30 }
   0xb   : > { %s5781_s17 = smov (%p37_p0, %s35_s17), 0  ;;  %p262_p5 = scmp.eq.s32.totalorder %s3972_s16, 1 }
   0xc   : > { %5763 = sst [smem:[#allocation8_spill]] %s5781_s17  ;;  %p5226_p4 = por %p256_p2, %p255_p1 }
   0xd   : > { %s240_s20 = ssub.s32 %s5123_s13, %s5781_s17  ;;  %p3973_p6 = scmp.ge.s32.totalorder %s5127_s14, 1 }
   0xe   : > { %s5764_s19 = scalar_select %p5226_p4, 1, 0 }
   0xf   : > { %p243_p7 = scmp.eq.s32.totalorder %s240_s20, 0  ;;  %p5233_p8 = por %p262_p5, %p261_p3 }
  0x10   : > { %p269_p9 = scmp.lt.s32.totalorder %s5127_s14, 3  ;;  %p5245_p11 = scmp.eq.s32.totalorder %s3971_s15, 0 }
  0x11   : > { %s5765_s21 = scalar_select %p5233_p8, 1, 0 }
  0x12   : > { %s5239_s22 = scalar_select %p243_p7, %s5115_s11, %s245_s18  }
  0x13   : > { %p5241_p10 = pnand %p3973_p6, %p269_p9  ;;  %s5129_s25 = smov [#allocation2]  }
  0x14   : > { %s5767_s24 = scalar_select %p5245_p11, 1, 0 }
  0x15   : > { %s5766_s23 = scalar_select %p5241_p10, 1, 0 }
  0x16   : > { %p4504_p12 = pneg %p5241_p10  ;;  %s284_s26 = sshll.u32 %s5129_s25, 4  ;;  %s285_s26 = int_to_ptr.vmem [resolvable:$true] %s284_s26 }
  0x17   : > { %s5769_s3 = sld [smem:[#allocation9_spill]] }
  0x18   : > { %p5253_p13 = pnand %p5245_p11, %p4504_p12 }
  0x1a   : > { %p5019_p1 = pneg %p5253_p13 }
  0x1d   : > { %s5017_s16 = scalar_lea.hbm %s5769_s3, 32768 }
  0x1e   : > { %p5018_p0 = scmp.ne.s32.totalorder %s5769_s3, %s5017_s16  ;;  %p5024_p5 = scmp.lt.u32.totalorder %s5017_s16, %s5769_s3 }
  0x20   : > { %p5020_p2 = pnand %p5019_p1, %p5018_p0 }
  0x22   : > { %p5021_p3 = pneg %p5020_p2 }
  0x24   : > { %p5026_p6 = pnand %p5024_p5, %p5021_p3 }
  0x26   : > { %5029 = shalt.err (!%p5026_p6)
}
  0x27   : > { %s5030_s17 = scalar_lea.vmem %s285_s26, 32768  ;;  %p5038_p8 = scmp.lt.s32.totalorder %s285_s26, %s285_s26 }
  0x28   : > { %p5031_p7 = scmp.ne.s32.totalorder %s285_s26, %s5030_s17  ;;  %p5039_p4 = scmp.lt.s32.totalorder %s5030_s17, %s5030_s17 }
  0x2a   : > { %p5033_p9 = pnand %p5031_p7, %p5019_p1  ;;  %p5040_p11 = por %p5039_p4, %p5038_p8 }
  0x2c   : > { %p5034_p12 = pneg %p5033_p9 }
  0x2e   : > { %p5041_p10 = pnand %p5040_p11, %p5034_p12 }
  0x30   : > { %5044 = shalt.err (!%p5041_p10)
}
  0x31   : > { %s5130_s28 = smov 128   ;;  %s5131_s29 = smov 8  }
  0x32   : > { %4507 = dma.hbm_to_vmem [thread:$0]  (!%p5253_p13), %s5769_s3, 32768, %s285_s26, [#allocation3], %s5130_s28, %s5130_s28, %s5131_s29  }
  0x33   : > { %p5770_p0 = scmp.ne.s32.totalorder %s5766_s23, 0 }
  0x34   : > { %p5771_p2 = scmp.ne.s32.totalorder (!%p5770_p0), %s5767_s24, 0 }
  0x35   : > { %334 = sbr.rel (%p5770_p0) target bundleno = 2557 (0x9fd), region = 56 }
  0x3c   : > { %5098 = dma.done.wait (%p5771_p2), [#allocation3], 32768  }
  0x3d   : > { %5100 = vsyncadd (%p5771_p2), [#allocation3], 4294934528  ;;  %v5132_v0 = vmov 0   ;;  %p378_p4 = scmp.lt.s32.totalorder %s5119_s12, 1  ;;  %v4569_v1 = vld [vmem:[%s5749_s2 + $0x4] ss:$8 sps:$4 sm:$0xff]  }
  0x3e   : > { %502 = vmatprep.mubr.bf16.mxu0 %v5132_v0  ;;  %v4571_v2 = vld [vmem:[%s5749_s2] ss:$8 sps:$4 sm:$0xff]   ;;  %470 = vmatprep.subr.bf16.mxu0 %v4569_v1  ;;  %v4572_v3 = vld [vmem:[%s5749_s2 + $0x14] ss:$8 sps:$4 sm:$0xff]   ;;  %v4574_v4 = vld [vmem:[%s5749_s2 + $0x10] ss:$8 sps:$4 sm:$0xff]  }
  0x3f   : > { %s5285_s26 = scalar_select %p378_p4, %s5119_s12, 1  ;;  %471 = vmatpush1.bf16.msra.mxu0 %v4571_v2  ;;  %v4575_v5 = vld [vmem:[%s5749_s2 + $0x24] ss:$8 sps:$4 sm:$0xff]   ;;  %v4577_v6 = vld [vmem:[%s5749_s2 + $0x20] ss:$8 sps:$4 sm:$0xff]   ;;  %vm463_vm0 = vcmask 1045504  }
  0x40   : > { %472 = vmatprep.subr.bf16.mxu0 %v4572_v3  ;;  %v4578_v7 = vld [vmem:[%s5749_s2 + $0x34] ss:$8 sps:$4 sm:$0x3f]   ;;  %v4580_v8 = vld [vmem:[%s5749_s2 + $0x30] ss:$8 sps:$4 sm:$0x3f]  }
  0x41   : > { %s4333_s18 = sshll.u32 %s5285_s26, 6  ;;  %v4581_v9 = vld [vmem:[#allocation2 + $0x4] ss:$8 sps:$4 sm:$0xff]   ;;  %v4583_v10 = vld [vmem:[#allocation2] ss:$8 sps:$4 sm:$0xff]   ;;  %v465_v15 = vsel %vm463_vm0, %v4580_v8, 0  ;;  %s389_s24 = scalar_lea.vmem %s5748_s1, %s5285_s26 }
  0x42   : > { %s5312_s3 = scalar_lea.vmem %s5747_s0, %s4333_s18  ;;  %787 = vmatprep.subr.bf16.mxu1 %v4581_v9  ;;  %v4584_v12 = vld [vmem:[#allocation2 + $0x14] ss:$8 sps:$4 sm:$0xff]   ;;  %v4586_v14 = vld [vmem:[#allocation2 + $0x10] ss:$8 sps:$4 sm:$0xff]   ;;  %v4587_v16 = vld [vmem:[#allocation2 + $0x24] ss:$8 sps:$4 sm:$0xff]  }
  0x43   : > { %473 = vmatpush1.bf16.msra.mxu0 %v4574_v4  ;;  %v392_v11 = vld [vmem:[%s5312_s3] sm:$0xff]  ;;  %v393_v13 = vld [vmem:[%s5312_s3 + $0x8] sm:$0xff]  ;;  %788 = vmatpush1.bf16.msra.mxu1 %v4583_v10  ;;  %vm450_vm1 = vcmask 490496   ;;  %v4590_v19 = vld [vmem:[#allocation2 + $0x34] ss:$8 sps:$4 sm:$0xff]   ;;  %s374_s26 = sand.u32 1, %s5111_s10  }
  0x44   : > { %474 = vmatprep.subr.bf16.mxu0 %v4575_v5  ;;  %789 = vmatprep.subr.bf16.mxu1 %v4584_v12  ;;  %v5318_v17 = vpack.c.bf16 %v393_v13, %v392_v11  ;;  %v4589_v18 = vld [vmem:[#allocation2 + $0x20] ss:$8 sps:$4 sm:$0xff]   ;;  %v394_v20 = vld [vmem:[%s5312_s3 + $0x10] sm:$0xff]  ;;  %v395_v21 = vld [vmem:[%s5312_s3 + $0x18] sm:$0xff]  ;;  %s3978_s28 = sshll.u32 %s374_s26, 5  ;;  %s4342_s15 = sshll.u32 %s5119_s12, 9 }
  0x45   : > { %v4592_v22 = vld [vmem:[#allocation2 + $0x30] ss:$8 sps:$4 sm:$0xff]   ;;  %v4593_v23 = vld [vmem:[#allocation2 + $0x44] ss:$8 sps:$4 sm:$0xff]   ;;  %v5325_v24 = vpack.c.bf16 %v395_v21, %v394_v20  ;;  %v4595_v25 = vld [vmem:[#allocation2 + $0x40] ss:$8 sps:$4 sm:$0xff]   ;;  %v553_v20 = vlaneseq  ;;  %s5697_s27 = scalar_lea.hbm %s5756_s9, %s4342_s15 }
  0x46   : > { %v4596_v26 = vld [vmem:[#allocation2 + $0x54] ss:$8 sps:$4 sm:$0xff]   ;;  %v396_v27 = vld [vmem:[%s5312_s3 + $0x20] sm:$0xff]  ;;  %v397_v28 = vld [vmem:[%s5312_s3 + $0x28] sm:$0xff]  ;;  %s5701_s12 = scalar_lea.sflag [#allocation4], %s374_s26  ;;  %p5772_p10 = scmp.ne.s32.totalorder %s5764_s19, 0 }
  0x47   : > { %475 = vmatpush1.bf16.msra.mxu0 %v4577_v6  ;;  %790 = vmatpush1.bf16.msra.mxu1 %v4586_v14  ;;  %v4598_v29 = vld [vmem:[#allocation2 + $0x50] ss:$8 sps:$4 sm:$0xff]   ;;  %v4599_v30 = vld [vmem:[#allocation2 + $0x64] ss:$8 sps:$4 sm:$0xff]   ;;  %v4601_v31 = vld [vmem:[#allocation2 + $0x60] ss:$8 sps:$4 sm:$0xff]   ;;  %v5332_v32 = vpack.c.bf16 %v397_v28, %v396_v27 }
  0x48   : > { %3989 = vmatprep.subr.msk.bf16.mxu0 %vm463_vm0, %v4578_v7  ;;  %791 = vmatprep.subr.bf16.mxu1 %v4587_v16  ;;  %v4602_v33 = vld [vmem:[#allocation2 + $0x74] ss:$8 sps:$4 sm:$0xff]   ;;  %v4604_v36 = vld [vmem:[#allocation2 + $0x70] ss:$8 sps:$4 sm:$0xff]   ;;  %v4605_v37 = vld [vmem:[#allocation2 + $0x84] ss:$8 sps:$4 sm:$0xff]  }
  0x49   : > { %v398_v34 = vld [vmem:[%s5312_s3 + $0x30] sm:$0xff]  ;;  %v399_v35 = vld [vmem:[%s5312_s3 + $0x38] sm:$0xff]  ;;  %v4607_v38 = vld [vmem:[#allocation2 + $0x80] ss:$8 sps:$4 sm:$0xff]   ;;  %v554_v21 = vshrl.u32 %v553_v20, 7  ;;  %s376_s3 = scalar_lea.vmem [#allocation5], %s3978_s28 }
  0x4a   : > { %v5339_v39 = vpack.c.bf16 %v399_v35, %v398_v34  ;;  %v4608_v40 = vld [vmem:[#allocation2 + $0x94] ss:$8 sps:$4 sm:$0xff]   ;;  %v4610_v41 = vld [vmem:[#allocation2 + $0x90] ss:$8 sps:$4 sm:$0xff]   ;;  %v4611_v42 = vld [vmem:[#allocation2 + $0xa4] ss:$8 sps:$4 sm:$0xff]  }
  0x4b   : > { %477 = vmatpush1.bf16.msra.mxu0 %v465_v15  ;;  %792 = vmatpush1.bf16.msra.mxu1 %v4589_v18  ;;  %v4613_v43 = vld [vmem:[#allocation2 + $0xa0] ss:$8 sps:$4 sm:$0xff]   ;;  %v4614_v44 = vld [vmem:[#allocation2 + $0xb4] ss:$8 sps:$4 sm:$0xff]   ;;  %v4616_v45 = vld [vmem:[#allocation2 + $0xb0] ss:$8 sps:$4 sm:$0xff]  }
  0x4c   : > { %793 = vmatprep.subr.bf16.mxu1 %v4590_v19  ;;  %v4617_v46 = vld [vmem:[#allocation2 + $0xc4] ss:$8 sps:$4 sm:$0xff]   ;;  %v4619_v47 = vld [vmem:[#allocation2 + $0xc0] ss:$8 sps:$4 sm:$0xff]   ;;  %v4620_v48 = vld [vmem:[#allocation2 + $0xd4] ss:$8 sps:$4 sm:$0xff]  }
  0x4d   : > { %v4622_v49 = vld [vmem:[#allocation2 + $0xd0] ss:$8 sps:$4 sm:$0xff]   ;;  %v4623_v50 = vld [vmem:[#allocation2 + $0xe4] ss:$8 sps:$4 sm:$0xff]   ;;  %v4625_v51 = vld [vmem:[#allocation2 + $0xe0] ss:$8 sps:$4 sm:$0xff]  }
  0x4e   : > { %3990 = vmatmul.mubr.msk.bf16.vlgmr.msra.gmra.mrb[0].mxu0 %vm450_vm1, %v5318_v17  ;;  %v4626_v52 = vld [vmem:[#allocation2 + $0xf4] ss:$8 sps:$4 sm:$0xff]   ;;  %v4628_v53 = vld [vmem:[#allocation2 + $0xf0] ss:$8 sps:$4 sm:$0xff]   ;;  %v4629_v54 = vld [vmem:[#allocation2 + $0x100] ss:$8 sps:$4 sm:$0xff]  }
  0x4f   : > { %512 = vmatprep.mubr.bf16.mxu0 %v5132_v0  ;;  %794 = vmatpush1.bf16.msra.mxu1 %v4592_v22  ;;  %v4631_v55 = vld [vmem:[#allocation2 + $0x104] ss:$8 sps:$4 sm:$0xff]   ;;  %v4634_v56 = vld [vmem:[#allocation2 + $0x114] ss:$8 sps:$4 sm:$0xff]   ;;  %v4632_v57 = vld [vmem:[#allocation2 + $0x110] ss:$8 sps:$4 sm:$0xff]  }
  0x50   : > { %795 = vmatprep.subr.bf16.mxu1 %v4593_v23  ;;  %1106 = vmatprep.subr.bf16.mxu0 %v4631_v55  ;;  %v4637_v58 = vld [vmem:[#allocation2 + $0x124] ss:$8 sps:$4 sm:$0xff]   ;;  %v4635_v59 = vld [vmem:[#allocation2 + $0x120] ss:$8 sps:$4 sm:$0xff]   ;;  %v4640_v60 = vld [vmem:[#allocation2 + $0x134] ss:$8 sps:$4 sm:$0xff]  }
  0x51   : > { %1107 = vmatpush1.bf16.msra.mxu0 %v4629_v54  ;;  %v4638_v61 = vld [vmem:[#allocation2 + $0x130] ss:$8 sps:$4 sm:$0xff]   ;;  %v4643_v62 = vld [vmem:[#allocation2 + $0x144] ss:$8 sps:$4 sm:$0xff]   ;;  %v4641_v63 = vld [vmem:[#allocation2 + $0x140] ss:$8 sps:$4 sm:$0xff]  }
  0x52   : > { %1108 = vmatprep.subr.bf16.mxu0 %v4634_v56  ;;  %v4646_v1 = vld [vmem:[#allocation2 + $0x154] ss:$8 sps:$4 sm:$0xff]   ;;  %v4644_v2 = vld [vmem:[#allocation2 + $0x150] ss:$8 sps:$4 sm:$0xff]   ;;  %v4649_v3 = vld [vmem:[#allocation2 + $0x164] ss:$8 sps:$4 sm:$0xff]  }
  0x53   : > { %796 = vmatpush1.bf16.msra.mxu1 %v4595_v25  ;;  %v4647_v4 = vld [vmem:[#allocation2 + $0x160] ss:$8 sps:$4 sm:$0xff]   ;;  %v4652_v5 = vld [vmem:[#allocation2 + $0x174] ss:$8 sps:$4 sm:$0xff]   ;;  %v4650_v6 = vld [vmem:[#allocation2 + $0x170] ss:$8 sps:$4 sm:$0xff]  }
  0x54   : > { %797 = vmatprep.subr.bf16.mxu1 %v4596_v26  ;;  %v4655_v7 = vld [vmem:[#allocation2 + $0x184] ss:$8 sps:$4 sm:$0xff]   ;;  %v4653_v8 = vld [vmem:[#allocation2 + $0x180] ss:$8 sps:$4 sm:$0xff]   ;;  %v4658_v9 = vld [vmem:[#allocation2 + $0x194] ss:$8 sps:$4 sm:$0xff]  }
  0x55   : > { %1109 = vmatpush1.bf16.msra.mxu0 %v4632_v57  ;;  %v4656_v10 = vld [vmem:[#allocation2 + $0x190] ss:$8 sps:$4 sm:$0xff]   ;;  %v4661_v11 = vld [vmem:[#allocation2 + $0x1a4] ss:$8 sps:$4 sm:$0xff]   ;;  %v4659_v12 = vld [vmem:[#allocation2 + $0x1a0] ss:$8 sps:$4 sm:$0xff]  }
  0x56   : > { %3991 = vmatmul.mubr.msk.bf16.gmra.mrb[4].mxu0 %vm450_vm1, %v5325_v24  ;;  %1110 = vmatprep.subr.bf16.mxu0 %v4637_v58  ;;  %v4664_v13 = vld [vmem:[#allocation2 + $0x1b4] ss:$8 sps:$4 sm:$0xff]   ;;  %v4662_v14 = vld [vmem:[#allocation2 + $0x1b0] ss:$8 sps:$4 sm:$0xff]   ;;  %v4667_v15 = vld [vmem:[#allocation2 + $0x1c4] ss:$8 sps:$4 sm:$0xff]  }
  0x57   : > { %522 = vmatprep.mubr.bf16.mxu0 %v5132_v0  ;;  %798 = vmatpush1.bf16.msra.mxu1 %v4598_v29  ;;  %v4665_v16 = vld [vmem:[#allocation2 + $0x1c0] ss:$8 sps:$4 sm:$0xff]   ;;  %v4670_v18 = vld [vmem:[#allocation2 + $0x1d4] ss:$8 sps:$4 sm:$0xff]   ;;  %v4668_v19 = vld [vmem:[#allocation2 + $0x1d0] ss:$8 sps:$4 sm:$0xff]  }
  0x58   : > { %799 = vmatprep.subr.bf16.mxu1 %v4599_v30  ;;  %v5343_v22 = vsub.s32 0, %v554_v21  ;;  %v551_v23 = vld [vmem:[%s5751_s4] ss:$8 sm:$0x3]  ;;  %v5348_v25 = vsub.s32 1, %v554_v21  ;;  %s3871_s29 = sshll.u32 %s376_s3, 4  ;;  %s5692_s29 = int_to_ptr.vmem [resolvable:$true] %s3871_s29 }
  0x59   : > { %1111 = vmatpush1.bf16.msra.mxu0 %v4635_v59  ;;  %v4682_v20 = vld [vmem:[#allocation2 + $0x214] ss:$8 sps:$4 sm:$0xff]   ;;  %v4680_v21 = vld [vmem:[#allocation2 + $0x210] ss:$8 sps:$4 sm:$0xff]   ;;  %s5045_s23 = scalar_lea.vmem %s5692_s29, 512  ;;  %s5133_s16 = smov [#allocation5]  }
  0x5a   : > { %1112 = vmatprep.subr.bf16.mxu0 %v4640_v60  ;;  %v556_v26 = vrot.slane %v551_v23, %v5343_v22  ;;  %v560_v27 = vrot.slane %v551_v23, %v5348_v25  ;;  %v4685_v23 = vld [vmem:[#allocation2 + $0x224] ss:$8 sps:$4 sm:$0xff]   ;;  %p5046_p8 = scmp.ne.s32.totalorder %s5692_s29, %s5045_s23 }
  0x5b   : > { %800 = vmatpush1.bf16.msra.mxu1 %v4601_v31 }
  0x5c   : > { %801 = vmatprep.subr.bf16.mxu1 %v4602_v33  ;;  %v563_v28 = vpack.c.bf16 %v556_v26, %v556_v26  ;;  %v564_v29 = vpack.c.bf16 %v560_v27, %v560_v27  ;;  %v4683_v26 = vld [vmem:[#allocation2 + $0x220] ss:$8 sps:$4 sm:$0xff]   ;;  %v4688_v27 = vld [vmem:[#allocation2 + $0x234] ss:$8 sps:$4 sm:$0xff]   ;;  %p5047_p11 = pnand %p5046_p8, %p5772_p10 }
  0x5d   : > { %1113 = vmatpush1.bf16.msra.mxu0 %v4638_v61 }
  0x5e   : > { %3992 = vmatmul.mubr.msk.bf16.gmra.mrb[8].mxu0 %vm450_vm1, %v5332_v32  ;;  %1114 = vmatprep.subr.bf16.mxu0 %v4643_v62  ;;  %v566_v30 = vpack.i.b16 %v563_v28, %v563_v28  ;;  %v573_v31 = vpack.i.b16 %v564_v29, %v564_v29  ;;  %v4686_v28 = vld [vmem:[#allocation2 + $0x230] ss:$8 sps:$4 sm:$0xff]   ;;  %v4691_v29 = vld [vmem:[#allocation2 + $0x244] ss:$8 sps:$4 sm:$0xff]   ;;  %p5048_p13 = pneg %p5047_p11 }
  0x5f   : > { %532 = vmatprep.mubr.bf16.mxu0 %v5132_v0  ;;  %802 = vmatpush1.bf16.msra.mxu1 %v4604_v36 }
  0x60   : > { %803 = vmatprep.subr.bf16.mxu1 %v4605_v37  ;;  %v571_v35 = vrot.slane %v566_v30, %v5343_v22  ;;  %v578_v37 = vrot.slane %v573_v31, %v5343_v22  ;;  %v4689_v30 = vld [vmem:[#allocation2 + $0x240] ss:$8 sps:$4 sm:$0xff]   ;;  %v4694_v31 = vld [vmem:[#allocation2 + $0x254] ss:$8 sps:$4 sm:$0xff]  }
  0x61   : > { %1115 = vmatpush1.bf16.msra.mxu0 %v4641_v63 }
  0x62   : > { %1116 = vmatprep.subr.bf16.mxu0 %v4646_v1 }
  0x63   : > { %804 = vmatpush1.bf16.msra.mxu1 %v4607_v38 }
  0x64   : > { %805 = vmatprep.subr.bf16.mxu1 %v4608_v40 }
  0x65   : > { %1117 = vmatpush1.bf16.msra.mxu0 %v4644_v2 }
  0x66   : > { %3993 = vmatmul.mubr.msk.bf16.gmra.mrb[12].mxu0 %vm450_vm1, %v5339_v39  ;;  %1118 = vmatprep.subr.bf16.mxu0 %v4649_v3 }
  0x67   : > { %806 = vmatpush1.bf16.msra.mxu1 %v4610_v41 }
  0x68   : > { %807 = vmatprep.subr.bf16.mxu1 %v4611_v42 }
  0x69   : > { %1119 = vmatpush1.bf16.msra.mxu0 %v4647_v4 }
  0x6a   : > { %1120 = vmatprep.subr.bf16.mxu0 %v4652_v5 }
  0x6b   : > { %808 = vmatpush1.bf16.msra.mxu1 %v4613_v43 }
  0x6c   : > { %809 = vmatprep.subr.bf16.mxu1 %v4614_v44 }
  0x6d   : > { %1121 = vmatpush1.bf16.msra.mxu0 %v4650_v6 }
  0x6e   : > { %1122 = vmatprep.subr.bf16.mxu0 %v4655_v7 }
  0x6f   : > { %810 = vmatpush1.bf16.msra.mxu1 %v4616_v45 }
  0x70   : > { %811 = vmatprep.subr.bf16.mxu1 %v4617_v46 }
  0x71   : > { %1123 = vmatpush1.bf16.msra.mxu0 %v4653_v8 }
  0x72   : > { %1124 = vmatprep.subr.bf16.mxu0 %v4658_v9 }
  0x73   : > { %812 = vmatpush1.bf16.msra.mxu1 %v4619_v47 }
  0x74   : > { %813 = vmatprep.subr.bf16.mxu1 %v4620_v48 }
  0x75   : > { %1125 = vmatpush1.bf16.msra.mxu0 %v4656_v10 }
  0x76   : > { %1126 = vmatprep.subr.bf16.mxu0 %v4661_v11 }
  0x77   : > { %814 = vmatpush1.bf16.msra.mxu1 %v4622_v49 }
  0x78   : > { %815 = vmatprep.subr.bf16.mxu1 %v4623_v50 }
  0x79   : > { %1127 = vmatpush1.bf16.msra.mxu0 %v4659_v12 }
  0x7a   : > { %1128 = vmatprep.subr.bf16.mxu0 %v4664_v13  ;;  %v4673_v13 = vld [vmem:[#allocation2 + $0x1e4] ss:$8 sps:$4 sm:$0xff]  }
  0x7b   : > { %816 = vmatpush1.bf16.msra.mxu1 %v4625_v51 }
  0x7c   : > { %817 = vmatprep.subr.bf16.mxu1 %v4626_v52 }
  0x7d   : > { %1129 = vmatpush1.bf16.msra.mxu0 %v4662_v14  ;;  %v4671_v14 = vld [vmem:[#allocation2 + $0x1e0] ss:$8 sps:$4 sm:$0xff]  }
  0x7e   : > { %1130 = vmatprep.subr.bf16.mxu0 %v4667_v15  ;;  %v4676_v15 = vld [vmem:[#allocation2 + $0x1f4] ss:$8 sps:$4 sm:$0xff]  }
  0x7f   : > { %818 = vmatpush1.bf16.msra.mxu1 %v4628_v53 }
  0x81   : > { %1131 = vmatpush1.bf16.msra.mxu0 %v4665_v16  ;;  %v4674_v16 = vld [vmem:[#allocation2 + $0x1f0] ss:$8 sps:$4 sm:$0xff]  }
  0x82   : > { %1132 = vmatprep.subr.bf16.mxu0 %v4670_v18  ;;  %v4677_v18 = vld [vmem:[#allocation2 + $0x200] ss:$8 sps:$4 sm:$0xff]  }
  0x85   : > { %1133 = vmatpush1.bf16.msra.mxu0 %v4668_v19  ;;  %v4679_v19 = vld [vmem:[#allocation2 + $0x204] ss:$8 sps:$4 sm:$0xff]  }
  0x86   : > { %1134 = vmatprep.subr.bf16.mxu0 %v4673_v13  ;;  %1425 = vmatprep.subr.bf16.mxu1 %v4679_v19 }
  0x89   : > { %1135 = vmatpush1.bf16.msra.mxu0 %v4671_v14 }
  0x8a   : > { %1136 = vmatprep.subr.bf16.mxu0 %v4676_v15 }
  0x8d   : > { %1137 = vmatpush1.bf16.msra.mxu0 %v4674_v16 }
 0x121   : > { %v504_v33 = vpop.f32.mrb[0].mxu0 }
 0x122   : > { %v506_v34 = vpop.f32.mrb[1].mxu0 }
 0x123   : > { %v508_v36 = vpop.f32.mrb[2].mxu0 }
 0x124   : > { %v543_v38 = vpack.c.bf16 %v508_v36, %v504_v33  ;;  %v510_v40 = vpop.f32.mrb[3].mxu0  ;;  %v4692_v33 = vld [vmem:[#allocation2 + $0x250] ss:$8 sps:$4 sm:$0xff]   ;;  %v4700_v36 = vld [vmem:[#allocation2 + $0x274] ss:$8 sps:$4 sm:$0xff]  }
 0x125   : > { %v544_v41 = vpack.c.bf16 %v510_v40, %v506_v34  ;;  %v4697_v34 = vld [vmem:[#allocation2 + $0x264] ss:$8 sps:$4 sm:$0xff]   ;;  %v4701_v40 = vld [vmem:[#allocation2 + $0x280] ss:$8 sps:$4 sm:$0xff]  }
 0x126   : > { %v579_v42 = vadd.bf16 %v571_v35, %v543_v38  ;;  %v4703_v38 = vld [vmem:[#allocation2 + $0x284] ss:$8 sps:$4 sm:$0xff]  }
 0x127   : > { %v580_v43 = vadd.bf16 %v578_v37, %v544_v41  ;;  %v4706_v41 = vld [vmem:[#allocation2 + $0x294] ss:$8 sps:$4 sm:$0xff]  }
 0x128   : > { %v587_v47 = vmax.bf16 %v5132_v0, %v579_v42  ;;  %v4704_v42 = vld [vmem:[#allocation2 + $0x290] ss:$8 sps:$4 sm:$0xff]  }
 0x129   : > { %v514_v44 = vpop.f32.mrb[4].mxu0  ;;  %v588_v45 = vmax.bf16 %v5132_v0, %v580_v43  ;;  %v4709_v43 = vld [vmem:[#allocation2 + $0x2a4] ss:$8 sps:$4 sm:$0xff]  }
 0x12a   : > { %v516_v46 = vpop.f32.mrb[5].mxu0 }
 0x12b   : > { %v518_v48 = vpop.f32.mrb[6].mxu0  ;;  %819 = vmatprep.mubr.bf16.mxu1 %v588_v45  ;;  %v4712_v45 = vld [vmem:[#allocation2 + $0x2b4] ss:$8 sps:$4 sm:$0xff]  }
 0x12c   : > { %v545_v49 = vpack.c.bf16 %v518_v48, %v514_v44  ;;  %v520_v50 = vpop.f32.mrb[7].mxu0  ;;  %820 = vmatmul.mubr.bf16.vlgmr.msra.gmra.mrb[0].mxu1 %v587_v47  ;;  %v4707_v44 = vld [vmem:[#allocation2 + $0x2a0] ss:$8 sps:$4 sm:$0xff]   ;;  %v4715_v47 = vld [vmem:[#allocation2 + $0x2c4] ss:$8 sps:$4 sm:$0xff]  }
 0x12d   : > { %v546_v51 = vpack.c.bf16 %v520_v50, %v516_v46  ;;  %1426 = vmatpush1.bf16.msra.mxu1 %v4677_v18  ;;  %v4710_v46 = vld [vmem:[#allocation2 + $0x2b0] ss:$8 sps:$4 sm:$0xff]   ;;  %v4713_v48 = vld [vmem:[#allocation2 + $0x2c0] ss:$8 sps:$4 sm:$0xff]  }
 0x12e   : > { %v581_v52 = vadd.bf16 %v571_v35, %v545_v49  ;;  %1427 = vmatprep.subr.bf16.mxu1 %v4682_v20  ;;  %v4718_v49 = vld [vmem:[#allocation2 + $0x2d4] ss:$8 sps:$4 sm:$0xff]   ;;  %v4716_v50 = vld [vmem:[#allocation2 + $0x2d0] ss:$8 sps:$4 sm:$0xff]  }
 0x12f   : > { %v582_v53 = vadd.bf16 %v578_v37, %v546_v51  ;;  %v4026_v51 = vld [vmem:[%s5751_s4 + $0x1] ss:$8 sm:$0x3] }
 0x130   : > { %v589_v57 = vmax.bf16 %v5132_v0, %v581_v52  ;;  %v874_v52 = vrot.slane %v4026_v51, %v5343_v22 }
 0x131   : > { %v524_v54 = vpop.f32.mrb[8].mxu0  ;;  %v590_v55 = vmax.bf16 %v5132_v0, %v582_v53  ;;  %1428 = vmatpush1.bf16.msra.mxu1 %v4680_v21  ;;  %v878_v53 = vrot.slane %v4026_v51, %v5348_v25  ;;  %v4733_v51 = vld [vmem:[#allocation2 + $0x324] ss:$8 sps:$4 sm:$0xff]  }
 0x132   : > { %v526_v56 = vpop.f32.mrb[9].mxu0  ;;  %1429 = vmatprep.subr.bf16.mxu1 %v4685_v23 }
 0x133   : > { %v528_v58 = vpop.f32.mrb[10].mxu0  ;;  %829 = vmatprep.mubr.bf16.mxu1 %v590_v55  ;;  %v882_v55 = vpack.c.bf16 %v878_v53, %v878_v53  ;;  %v4736_v53 = vld [vmem:[#allocation2 + $0x334] ss:$8 sps:$4 sm:$0xff]  }
 0x134   : > { %v547_v59 = vpack.c.bf16 %v528_v58, %v524_v54  ;;  %v530_v60 = vpop.f32.mrb[11].mxu0  ;;  %830 = vmatmul.mubr.bf16.gmra.mrb[4].mxu1 %v589_v57  ;;  %v881_v54 = vpack.c.bf16 %v874_v52, %v874_v52  ;;  %v4731_v52 = vld [vmem:[#allocation2 + $0x320] ss:$8 sps:$4 sm:$0xff]  }
 0x135   : > { %v548_v61 = vpack.c.bf16 %v530_v60, %v526_v56  ;;  %1430 = vmatpush1.bf16.msra.mxu1 %v4683_v26  ;;  %v891_v57 = vpack.i.b16 %v882_v55, %v882_v55  ;;  %v4739_v55 = vld [vmem:[#allocation2 + $0x344] ss:$8 sps:$4 sm:$0xff]  }
 0x136   : > { %v583_v62 = vadd.bf16 %v571_v35, %v547_v59  ;;  %1431 = vmatprep.subr.bf16.mxu1 %v4688_v27  ;;  %v884_v56 = vpack.i.b16 %v881_v54, %v881_v54  ;;  %v4734_v54 = vld [vmem:[#allocation2 + $0x330] ss:$8 sps:$4 sm:$0xff]  }
 0x137   : > { %v584_v63 = vadd.bf16 %v578_v37, %v548_v61 }
 0x138   : > { %v591_v4 = vmax.bf16 %v5132_v0, %v583_v62  ;;  %v889_v60 = vrot.slane %v884_v56, %v5343_v22  ;;  %v896_v62 = vrot.slane %v891_v57, %v5343_v22  ;;  %v4737_v56 = vld [vmem:[#allocation2 + $0x340] ss:$8 sps:$4 sm:$0xff]   ;;  %v4742_v57 = vld [vmem:[#allocation2 + $0x354] ss:$8 sps:$4 sm:$0xff]  }
 0x139   : > { %v534_v1 = vpop.f32.mrb[12].mxu0  ;;  %v592_v2 = vmax.bf16 %v5132_v0, %v584_v63  ;;  %1432 = vmatpush1.bf16.msra.mxu1 %v4686_v28 }
 0x13a   : > { %v536_v3 = vpop.f32.mrb[13].mxu0  ;;  %1433 = vmatprep.subr.bf16.mxu1 %v4691_v29 }
 0x13b   : > { %v538_v5 = vpop.f32.mrb[14].mxu0  ;;  %839 = vmatprep.mubr.bf16.mxu1 %v592_v2 }
 0x13c   : > { %v549_v6 = vpack.c.bf16 %v538_v5, %v534_v1  ;;  %v540_v7 = vpop.f32.mrb[15].mxu0  ;;  %840 = vmatmul.mubr.bf16.gmra.mrb[8].mxu1 %v591_v4 }
 0x13d   : > { %v550_v8 = vpack.c.bf16 %v540_v7, %v536_v3  ;;  %1434 = vmatpush1.bf16.msra.mxu1 %v4689_v30 }
 0x13e   : > { %v585_v9 = vadd.bf16 %v571_v35, %v549_v6  ;;  %1435 = vmatprep.subr.bf16.mxu1 %v4694_v31  ;;  %v4695_v35 = vld [vmem:[#allocation2 + $0x260] ss:$8 sps:$4 sm:$0xff]  }
 0x13f   : > { %v586_v10 = vadd.bf16 %v578_v37, %v550_v8  ;;  %v4698_v37 = vld [vmem:[#allocation2 + $0x270] ss:$8 sps:$4 sm:$0xff]  }
 0x140   : > { %v593_v12 = vmax.bf16 %v5132_v0, %v585_v9 }
 0x141   : > { %v594_v11 = vmax.bf16 %v5132_v0, %v586_v10  ;;  %1436 = vmatpush1.bf16.msra.mxu1 %v4692_v33 }
 0x142   : > { %1437 = vmatprep.subr.bf16.mxu1 %v4697_v34 }
 0x143   : > { %849 = vmatprep.mubr.bf16.mxu1 %v594_v11 }
 0x144   : > { %850 = vmatmul.mubr.bf16.gmra.mrb[12].mxu1 %v593_v12 }
 0x145   : > { %1438 = vmatpush1.bf16.msra.mxu1 %v4695_v35 }
 0x146   : > { %1439 = vmatprep.subr.bf16.mxu1 %v4700_v36 }
 0x149   : > { %1440 = vmatpush1.bf16.msra.mxu1 %v4698_v37 }
 0x14a   : > { %1441 = vmatprep.subr.bf16.mxu1 %v4703_v38 }
 0x14d   : > { %1442 = vmatpush1.bf16.msra.mxu1 %v4701_v40 }
 0x14e   : > { %1443 = vmatprep.subr.bf16.mxu1 %v4706_v41 }
 0x151   : > { %1444 = vmatpush1.bf16.msra.mxu1 %v4704_v42 }
 0x152   : > { %1445 = vmatprep.subr.bf16.mxu1 %v4709_v43  ;;  %v4721_v43 = vld [vmem:[#allocation2 + $0x2e4] ss:$8 sps:$4 sm:$0xff]  }
 0x155   : > { %1446 = vmatpush1.bf16.msra.mxu1 %v4707_v44  ;;  %v4719_v44 = vld [vmem:[#allocation2 + $0x2e0] ss:$8 sps:$4 sm:$0xff]  }
 0x156   : > { %1447 = vmatprep.subr.bf16.mxu1 %v4712_v45  ;;  %v4724_v45 = vld [vmem:[#allocation2 + $0x2f4] ss:$8 sps:$4 sm:$0xff]  }
 0x159   : > { %1448 = vmatpush1.bf16.msra.mxu1 %v4710_v46  ;;  %v4722_v46 = vld [vmem:[#allocation2 + $0x2f0] ss:$8 sps:$4 sm:$0xff]  }
 0x15a   : > { %1449 = vmatprep.subr.bf16.mxu1 %v4715_v47  ;;  %v4725_v47 = vld [vmem:[#allocation2 + $0x300] ss:$8 sps:$4 sm:$0xff]  }
 0x15d   : > { %1450 = vmatpush1.bf16.msra.mxu1 %v4713_v48  ;;  %v4727_v48 = vld [vmem:[#allocation2 + $0x304] ss:$8 sps:$4 sm:$0xff]  }
 0x15e   : > { %1451 = vmatprep.subr.bf16.mxu1 %v4718_v49  ;;  %v4730_v49 = vld [vmem:[#allocation2 + $0x314] ss:$8 sps:$4 sm:$0xff]   ;;  %1744 = vmatprep.subr.bf16.mxu0 %v4727_v48 }
 0x161   : > { %1452 = vmatpush1.bf16.msra.mxu1 %v4716_v50  ;;  %v4728_v50 = vld [vmem:[#allocation2 + $0x310] ss:$8 sps:$4 sm:$0xff]  }
 0x162   : > { %1453 = vmatprep.subr.bf16.mxu1 %v4721_v43 }
 0x165   : > { %1454 = vmatpush1.bf16.msra.mxu1 %v4719_v44 }
 0x166   : > { %1455 = vmatprep.subr.bf16.mxu1 %v4724_v45 }
 0x169   : > { %1456 = vmatpush1.bf16.msra.mxu1 %v4722_v46 }
 0x1ff   : > { %v821_v58 = vpop.f32.mrb[0].mxu1 }
 0x200   : > { %v823_v59 = vpop.f32.mrb[1].mxu1 }
 0x201   : > { %v825_v61 = vpop.f32.mrb[2].mxu1 }
 0x202   : > { %v860_v63 = vpack.c.bf16 %v825_v61, %v821_v58  ;;  %v827_v1 = vpop.f32.mrb[3].mxu1  ;;  %v4740_v58 = vld [vmem:[#allocation2 + $0x350] ss:$8 sps:$4 sm:$0xff]   ;;  %v4748_v61 = vld [vmem:[#allocation2 + $0x374] ss:$8 sps:$4 sm:$0xff]  }
 0x203   : > { %v861_v2 = vpack.c.bf16 %v827_v1, %v823_v59  ;;  %v4745_v59 = vld [vmem:[#allocation2 + $0x364] ss:$8 sps:$4 sm:$0xff]   ;;  %v4749_v1 = vld [vmem:[#allocation2 + $0x380] ss:$8 sps:$4 sm:$0xff]  }
 0x204   : > { %v897_v3 = vadd.bf16 %v889_v60, %v860_v63  ;;  %v4751_v63 = vld [vmem:[#allocation2 + $0x384] ss:$8 sps:$4 sm:$0xff]  }
 0x205   : > { %v898_v4 = vadd.bf16 %v896_v62, %v861_v2  ;;  %v4754_v2 = vld [vmem:[#allocation2 + $0x394] ss:$8 sps:$4 sm:$0xff]  }
 0x206   : > { %v905_v7 = vmax.bf16 %v5132_v0, %v897_v3  ;;  %v4752_v3 = vld [vmem:[#allocation2 + $0x390] ss:$8 sps:$4 sm:$0xff]  }
 0x207   : > { %v831_v5 = vpop.f32.mrb[4].mxu1  ;;  %v906_v6 = vmax.bf16 %v5132_v0, %v898_v4  ;;  %v4757_v4 = vld [vmem:[#allocation2 + $0x3a4] ss:$8 sps:$4 sm:$0xff]  }
 0x208   : > { %v833_v8 = vpop.f32.mrb[5].mxu1 }
 0x209   : > { %v835_v9 = vpop.f32.mrb[6].mxu1  ;;  %1138 = vmatprep.mubr.bf16.mxu0 %v906_v6  ;;  %v4760_v6 = vld [vmem:[#allocation2 + $0x3b4] ss:$8 sps:$4 sm:$0xff]  }
 0x20a   : > { %v862_v10 = vpack.c.bf16 %v835_v9, %v831_v5  ;;  %v837_v11 = vpop.f32.mrb[7].mxu1  ;;  %1139 = vmatmul.mubr.bf16.vlgmr.msra.gmra.mrb[16].mxu0 %v905_v7  ;;  %v4755_v5 = vld [vmem:[#allocation2 + $0x3a0] ss:$8 sps:$4 sm:$0xff]   ;;  %v4758_v7 = vld [vmem:[#allocation2 + $0x3b0] ss:$8 sps:$4 sm:$0xff]  }
 0x20b   : > { %v863_v12 = vpack.c.bf16 %v837_v11, %v833_v8  ;;  %1745 = vmatpush1.bf16.msra.mxu0 %v4725_v47  ;;  %v4763_v8 = vld [vmem:[#allocation2 + $0x3c4] ss:$8 sps:$4 sm:$0xff]   ;;  %v4761_v9 = vld [vmem:[#allocation2 + $0x3c0] ss:$8 sps:$4 sm:$0xff]   ;;  %v4764_v11 = vld [vmem:[#allocation2 + $0x3d0] ss:$8 sps:$4 sm:$0xff]  }
 0x20c   : > { %v899_v13 = vadd.bf16 %v889_v60, %v862_v10  ;;  %1746 = vmatprep.subr.bf16.mxu0 %v4730_v49  ;;  %v4766_v10 = vld [vmem:[#allocation2 + $0x3d4] ss:$8 sps:$4 sm:$0xff]  }
 0x20d   : > { %v900_v14 = vadd.bf16 %v896_v62, %v863_v12  ;;  %v4059_v12 = vld [vmem:[%s5751_s4 + $0x2] ss:$8 sm:$0x3] }
 0x20e   : > { %v907_v19 = vmax.bf16 %v5132_v0, %v899_v13  ;;  %v1193_v13 = vrot.slane %v4059_v12, %v5343_v22 }
 0x20f   : > { %v841_v15 = vpop.f32.mrb[8].mxu1  ;;  %v908_v16 = vmax.bf16 %v5132_v0, %v900_v14  ;;  %1747 = vmatpush1.bf16.msra.mxu0 %v4728_v50  ;;  %v1197_v14 = vrot.slane %v4059_v12, %v5348_v25  ;;  %v4781_v12 = vld [vmem:[%s5749_s2 + $0x64] ss:$8 sps:$4 sm:$0xff]  }
 0x210   : > { %v843_v18 = vpop.f32.mrb[9].mxu1  ;;  %1748 = vmatprep.subr.bf16.mxu0 %v4733_v51 }
 0x211   : > { %v845_v20 = vpop.f32.mrb[10].mxu1  ;;  %1148 = vmatprep.mubr.bf16.mxu0 %v908_v16  ;;  %v1201_v16 = vpack.c.bf16 %v1197_v14, %v1197_v14  ;;  %v4782_v14 = vld [vmem:[%s5749_s2 + $0x74] ss:$8 sps:$4 sm:$0x3f]  }
 0x212   : > { %v864_v21 = vpack.c.bf16 %v845_v20, %v841_v15  ;;  %v847_v23 = vpop.f32.mrb[11].mxu1  ;;  %1149 = vmatmul.mubr.bf16.gmra.mrb[20].mxu0 %v907_v19  ;;  %v1200_v15 = vpack.c.bf16 %v1193_v13, %v1193_v13  ;;  %v4779_v13 = vld [vmem:[%s5749_s2 + $0x60] ss:$8 sps:$4 sm:$0xff]  }
 0x213   : > { %v865_v26 = vpack.c.bf16 %v847_v23, %v843_v18  ;;  %1749 = vmatpush1.bf16.msra.mxu0 %v4731_v52  ;;  %v1210_v19 = vpack.i.b16 %v1201_v16, %v1201_v16 }
 0x214   : > { %v901_v27 = vadd.bf16 %v889_v60, %v864_v21  ;;  %1750 = vmatprep.subr.bf16.mxu0 %v4736_v53  ;;  %v1203_v18 = vpack.i.b16 %v1200_v15, %v1200_v15  ;;  %v4784_v15 = vld [vmem:[%s5749_s2 + $0x70] ss:$8 sps:$4 sm:$0x3f]  }
 0x215   : > { %v902_v28 = vadd.bf16 %v896_v62, %v865_v26  ;;  %v1951_v16 = vsel %vm463_vm0, %v4784_v15, 0 }
 0x216   : > { %v909_v33 = vmax.bf16 %v5132_v0, %v901_v27  ;;  %v1208_v23 = vrot.slane %v1203_v18, %v5343_v22  ;;  %v1215_v27 = vrot.slane %v1210_v19, %v5343_v22  ;;  %v4787_v18 = vld [vmem:[#allocation2 + $0x404] ss:$8 sps:$4 sm:$0xff]   ;;  %v4785_v19 = vld [vmem:[#allocation2 + $0x400] ss:$8 sps:$4 sm:$0xff]  }
 0x217   : > { %v851_v29 = vpop.f32.mrb[12].mxu1  ;;  %v910_v30 = vmax.bf16 %v5132_v0, %v902_v28  ;;  %1751 = vmatpush1.bf16.msra.mxu0 %v4734_v54 }
 0x218   : > { %v853_v31 = vpop.f32.mrb[13].mxu1  ;;  %1752 = vmatprep.subr.bf16.mxu0 %v4739_v55 }
 0x219   : > { %v855_v34 = vpop.f32.mrb[14].mxu1  ;;  %1158 = vmatprep.mubr.bf16.mxu0 %v910_v30 }
 0x21a   : > { %v866_v35 = vpack.c.bf16 %v855_v34, %v851_v29  ;;  %v857_v36 = vpop.f32.mrb[15].mxu1  ;;  %1159 = vmatmul.mubr.bf16.gmra.mrb[24].mxu0 %v909_v33 }
 0x21b   : > { %v867_v37 = vpack.c.bf16 %v857_v36, %v853_v31  ;;  %1753 = vmatpush1.bf16.msra.mxu0 %v4737_v56 }
 0x21c   : > { %v903_v38 = vadd.bf16 %v889_v60, %v866_v35  ;;  %1754 = vmatprep.subr.bf16.mxu0 %v4742_v57  ;;  %v4743_v60 = vld [vmem:[#allocation2 + $0x360] ss:$8 sps:$4 sm:$0xff]  }
 0x21d   : > { %v904_v40 = vadd.bf16 %v896_v62, %v867_v37  ;;  %v4746_v62 = vld [vmem:[#allocation2 + $0x370] ss:$8 sps:$4 sm:$0xff]  }
 0x21e   : > { %v911_v42 = vmax.bf16 %v5132_v0, %v903_v38 }
 0x21f   : > { %v912_v41 = vmax.bf16 %v5132_v0, %v904_v40  ;;  %1755 = vmatpush1.bf16.msra.mxu0 %v4740_v58 }
 0x220   : > { %1756 = vmatprep.subr.bf16.mxu0 %v4745_v59 }
 0x221   : > { %1168 = vmatprep.mubr.bf16.mxu0 %v912_v41 }
 0x222   : > { %1169 = vmatmul.mubr.bf16.gmra.mrb[28].mxu0 %v911_v42 }
 0x223   : > { %1757 = vmatpush1.bf16.msra.mxu0 %v4743_v60 }
 0x224   : > { %1758 = vmatprep.subr.bf16.mxu0 %v4748_v61 }
 0x227   : > { %1759 = vmatpush1.bf16.msra.mxu0 %v4746_v62 }
 0x228   : > { %1760 = vmatprep.subr.bf16.mxu0 %v4751_v63 }
 0x22b   : > { %1761 = vmatpush1.bf16.msra.mxu0 %v4749_v1 }
 0x22c   : > { %1762 = vmatprep.subr.bf16.mxu0 %v4754_v2 }
 0x22f   : > { %1763 = vmatpush1.bf16.msra.mxu0 %v4752_v3 }
 0x230   : > { %1764 = vmatprep.subr.bf16.mxu0 %v4757_v4  ;;  %v4769_v4 = vld [vmem:[#allocation2 + $0x3e4] ss:$8 sps:$4 sm:$0xff]  }
 0x233   : > { %1765 = vmatpush1.bf16.msra.mxu0 %v4755_v5  ;;  %v4767_v5 = vld [vmem:[#allocation2 + $0x3e0] ss:$8 sps:$4 sm:$0xff]  }
 0x234   : > { %1766 = vmatprep.subr.bf16.mxu0 %v4760_v6  ;;  %v4772_v6 = vld [vmem:[#allocation2 + $0x3f4] ss:$8 sps:$4 sm:$0xff]  }
 0x237   : > { %1767 = vmatpush1.bf16.msra.mxu0 %v4758_v7  ;;  %v4770_v7 = vld [vmem:[#allocation2 + $0x3f0] ss:$8 sps:$4 sm:$0xff]  }
 0x238   : > { %1768 = vmatprep.subr.bf16.mxu0 %v4763_v8  ;;  %v4773_v8 = vld [vmem:[%s5749_s2 + $0x40] ss:$8 sps:$4 sm:$0xff]  }
 0x23b   : > { %1769 = vmatpush1.bf16.msra.mxu0 %v4761_v9  ;;  %v4775_v9 = vld [vmem:[%s5749_s2 + $0x44] ss:$8 sps:$4 sm:$0xff]  }
 0x23c   : > { %1770 = vmatprep.subr.bf16.mxu0 %v4766_v10  ;;  %v4778_v10 = vld [vmem:[%s5749_s2 + $0x54] ss:$8 sps:$4 sm:$0xff]   ;;  %1956 = vmatprep.subr.bf16.mxu1 %v4775_v9 }
 0x23f   : > { %1771 = vmatpush1.bf16.msra.mxu0 %v4764_v11  ;;  %v4776_v11 = vld [vmem:[%s5749_s2 + $0x50] ss:$8 sps:$4 sm:$0xff]  }
 0x240   : > { %1772 = vmatprep.subr.bf16.mxu0 %v4769_v4 }
 0x243   : > { %1773 = vmatpush1.bf16.msra.mxu0 %v4767_v5 }
 0x244   : > { %1774 = vmatprep.subr.bf16.mxu0 %v4772_v6 }
 0x247   : > { %1775 = vmatpush1.bf16.msra.mxu0 %v4770_v7 }
 0x2dd   : > { %v1140_v20 = vpop.f32.mrb[16].mxu0 }
 0x2de   : > { %v1142_v21 = vpop.f32.mrb[17].mxu0 }
 0x2df   : > { %v1144_v26 = vpop.f32.mrb[18].mxu0 }
 0x2e0   : > { %v1179_v28 = vpack.c.bf16 %v1144_v26, %v1140_v20  ;;  %v1146_v29 = vpop.f32.mrb[19].mxu0  ;;  %v4790_v20 = vld [vmem:[#allocation2 + $0x414] ss:$8 sps:$4 sm:$0xff]   ;;  %v4791_v26 = vld [vmem:[#allocation2 + $0x420] ss:$8 sps:$4 sm:$0xff]  }
 0x2e1   : > { %v1180_v30 = vpack.c.bf16 %v1146_v29, %v1142_v21  ;;  %v4788_v21 = vld [vmem:[#allocation2 + $0x410] ss:$8 sps:$4 sm:$0xff]   ;;  %v4799_v29 = vld [vmem:[#allocation2 + $0x444] ss:$8 sps:$4 sm:$0xff]  }
 0x2e2   : > { %v1216_v31 = vadd.bf16 %v1208_v23, %v1179_v28  ;;  %v4794_v28 = vld [vmem:[#allocation2 + $0x430] ss:$8 sps:$4 sm:$0xff]  }
 0x2e3   : > { %v1217_v33 = vadd.bf16 %v1215_v27, %v1180_v30  ;;  %v4802_v30 = vld [vmem:[#allocation2 + $0x454] ss:$8 sps:$4 sm:$0xff]  }
 0x2e4   : > { %v1224_v36 = vmax.bf16 %v5132_v0, %v1216_v31  ;;  %v4800_v31 = vld [vmem:[#allocation2 + $0x450] ss:$8 sps:$4 sm:$0xff]  }
 0x2e5   : > { %v1150_v34 = vpop.f32.mrb[20].mxu0  ;;  %v1225_v35 = vmax.bf16 %v5132_v0, %v1217_v33  ;;  %v4805_v33 = vld [vmem:[#allocation2 + $0x464] ss:$8 sps:$4 sm:$0xff]  }
 0x2e6   : > { %v1152_v37 = vpop.f32.mrb[21].mxu0 }
 0x2e7   : > { %v1154_v38 = vpop.f32.mrb[22].mxu0  ;;  %1457 = vmatprep.mubr.bf16.mxu1 %v1225_v35  ;;  %v4806_v35 = vld [vmem:[#allocation2 + $0x470] ss:$8 sps:$4 sm:$0xff]  }
 0x2e8   : > { %v1181_v40 = vpack.c.bf16 %v1154_v38, %v1150_v34  ;;  %v1156_v41 = vpop.f32.mrb[23].mxu0  ;;  %1458 = vmatmul.mubr.bf16.vlgmr.msra.gmra.mrb[16].mxu1 %v1224_v36  ;;  %v4808_v34 = vld [vmem:[#allocation2 + $0x474] ss:$8 sps:$4 sm:$0xff]   ;;  %v4811_v36 = vld [vmem:[#allocation2 + $0x484] ss:$8 sps:$4 sm:$0xff]  }
 0x2e9   : > { %v1182_v42 = vpack.c.bf16 %v1156_v41, %v1152_v37  ;;  %1957 = vmatpush1.bf16.msra.mxu1 %v4773_v8  ;;  %v4809_v37 = vld [vmem:[#allocation2 + $0x480] ss:$8 sps:$4 sm:$0xff]   ;;  %v4812_v38 = vld [vmem:[#allocation2 + $0x490] ss:$8 sps:$4 sm:$0xff]  }
 0x2ea   : > { %v1218_v43 = vadd.bf16 %v1208_v23, %v1181_v40  ;;  %1958 = vmatprep.subr.bf16.mxu1 %v4778_v10  ;;  %v4817_v40 = vld [vmem:[#allocation2 + $0x4a4] ss:$8 sps:$4 sm:$0xff]   ;;  %v4815_v41 = vld [vmem:[#allocation2 + $0x4a0] ss:$8 sps:$4 sm:$0xff]  }
 0x2eb   : > { %v1219_v44 = vadd.bf16 %v1215_v27, %v1182_v42  ;;  %v4820_v42 = vld [vmem:[#allocation2 + $0x4b4] ss:$8 sps:$4 sm:$0xff]  }
 0x2ec   : > { %v1226_v48 = vmax.bf16 %v5132_v0, %v1218_v43  ;;  %v4818_v43 = vld [vmem:[#allocation2 + $0x4b0] ss:$8 sps:$4 sm:$0xff]  }
 0x2ed   : > { %v1160_v45 = vpop.f32.mrb[24].mxu0  ;;  %v1227_v46 = vmax.bf16 %v5132_v0, %v1219_v44  ;;  %1959 = vmatpush1.bf16.msra.mxu1 %v4776_v11  ;;  %v4821_v44 = vld [vmem:[#allocation2 + $0x4c0] ss:$8 sps:$4 sm:$0xff]  }
 0x2ee   : > { %v1162_v47 = vpop.f32.mrb[25].mxu0  ;;  %1960 = vmatprep.subr.bf16.mxu1 %v4781_v12 }
 0x2ef   : > { %v1164_v49 = vpop.f32.mrb[26].mxu0  ;;  %1467 = vmatprep.mubr.bf16.mxu1 %v1227_v46  ;;  %v4824_v46 = vld [vmem:[#allocation2 + $0x4d0] ss:$8 sps:$4 sm:$0xff]  }
 0x2f0   : > { %v1183_v50 = vpack.c.bf16 %v1164_v49, %v1160_v45  ;;  %v1166_v51 = vpop.f32.mrb[27].mxu0  ;;  %1468 = vmatmul.mubr.bf16.gmra.mrb[20].mxu1 %v1226_v48  ;;  %v4826_v45 = vld [vmem:[#allocation2 + $0x4d4] ss:$8 sps:$4 sm:$0xff]  }
 0x2f1   : > { %v1184_v52 = vpack.c.bf16 %v1166_v51, %v1162_v47  ;;  %1961 = vmatpush1.bf16.msra.mxu1 %v4779_v13  ;;  %v4092_v47 = vld [vmem:[%s5751_s4 + $0x3] ss:$8 sm:$0x3] }
 0x2f2   : > { %v1220_v53 = vadd.bf16 %v1208_v23, %v1183_v50  ;;  %4142 = vmatprep.subr.msk.bf16.mxu1 %vm463_vm0, %v4782_v14  ;;  %v1512_v48 = vrot.slane %v4092_v47, %v5343_v22  ;;  %v1516_v49 = vrot.slane %v4092_v47, %v5348_v25  ;;  %v4847_v47 = vld [vmem:[#allocation2 + $0x544] ss:$8 sps:$4 sm:$0xff]  }
 0x2f3   : > { %v1221_v54 = vadd.bf16 %v1215_v27, %v1184_v52 }
 0x2f4   : > { %v1228_v58 = vmax.bf16 %v5132_v0, %v1220_v53  ;;  %v1519_v50 = vpack.c.bf16 %v1512_v48, %v1512_v48  ;;  %v1520_v51 = vpack.c.bf16 %v1516_v49, %v1516_v49  ;;  %v4845_v48 = vld [vmem:[#allocation2 + $0x540] ss:$8 sps:$4 sm:$0xff]   ;;  %v4850_v49 = vld [vmem:[#allocation2 + $0x554] ss:$8 sps:$4 sm:$0xff]  }
 0x2f5   : > { %v1170_v55 = vpop.f32.mrb[28].mxu0  ;;  %v1229_v56 = vmax.bf16 %v5132_v0, %v1221_v54  ;;  %1963 = vmatpush1.bf16.msra.mxu1 %v1951_v16 }
 0x2f6   : > { %v1172_v57 = vpop.f32.mrb[29].mxu0  ;;  %2189 = vmatprep.subr.bf16.mxu1 %v4787_v18  ;;  %v1522_v52 = vpack.i.b16 %v1519_v50, %v1519_v50  ;;  %v1529_v53 = vpack.i.b16 %v1520_v51, %v1520_v51  ;;  %v4848_v50 = vld [vmem:[#allocation2 + $0x550] ss:$8 sps:$4 sm:$0xff]   ;;  %v4853_v51 = vld [vmem:[#allocation2 + $0x564] ss:$8 sps:$4 sm:$0xff]  }
 0x2f7   : > { %v1174_v59 = vpop.f32.mrb[30].mxu0  ;;  %1477 = vmatprep.mubr.bf16.mxu1 %v1229_v56 }
 0x2f8   : > { %v1185_v60 = vpack.c.bf16 %v1174_v59, %v1170_v55  ;;  %v1176_v61 = vpop.f32.mrb[31].mxu0  ;;  %1478 = vmatmul.mubr.bf16.gmra.mrb[24].mxu1 %v1228_v58  ;;  %v1527_v56 = vrot.slane %v1522_v52, %v5343_v22  ;;  %v1534_v58 = vrot.slane %v1529_v53, %v5343_v22  ;;  %v4851_v52 = vld [vmem:[#allocation2 + $0x560] ss:$8 sps:$4 sm:$0xff]   ;;  %v4856_v53 = vld [vmem:[#allocation2 + $0x574] ss:$8 sps:$4 sm:$0xff]  }
 0x2f9   : > { %v1186_v62 = vpack.c.bf16 %v1176_v61, %v1172_v57 }
 0x2fa   : > { %v1222_v63 = vadd.bf16 %v1208_v23, %v1185_v60  ;;  %v4793_v23 = vld [vmem:[#allocation2 + $0x424] ss:$8 sps:$4 sm:$0xff]  }
 0x2fb   : > { %v1223_v1 = vadd.bf16 %v1215_v27, %v1186_v62  ;;  %v4796_v27 = vld [vmem:[#allocation2 + $0x434] ss:$8 sps:$4 sm:$0xff]  }
 0x2fc   : > { %v1230_v3 = vmax.bf16 %v5132_v0, %v1222_v63 }
 0x2fd   : > { %v1231_v2 = vmax.bf16 %v5132_v0, %v1223_v1 }
 0x2ff   : > { %1487 = vmatprep.mubr.bf16.mxu1 %v1231_v2 }
 0x300   : > { %1488 = vmatmul.mubr.bf16.gmra.mrb[28].mxu1 %v1230_v3 }
 0x301   : > { %1988 = vmatprep.mubr.bf16.mxu1 %v5132_v0 }
 0x308   : > { %4143 = vmatmul.mubr.msk.bf16.vlgmr.msra.gmra.mrb[32].mxu1 %vm450_vm1, %v5318_v17  ;;  %v4797_v17 = vld [vmem:[#allocation2 + $0x440] ss:$8 sps:$4 sm:$0xff]  }
 0x309   : > { %2190 = vmatpush1.bf16.msra.mxu1 %v4785_v19  ;;  %1998 = vmatprep.mubr.bf16.mxu1 %v5132_v0 }
 0x30a   : > { %2191 = vmatprep.subr.bf16.mxu1 %v4790_v20 }
 0x30d   : > { %2192 = vmatpush1.bf16.msra.mxu1 %v4788_v21 }
 0x30e   : > { %2193 = vmatprep.subr.bf16.mxu1 %v4793_v23 }
 0x310   : > { %4144 = vmatmul.mubr.msk.bf16.gmra.mrb[36].mxu1 %vm450_vm1, %v5325_v24  ;;  %v4803_v24 = vld [vmem:[#allocation2 + $0x460] ss:$8 sps:$4 sm:$0xff]  }
 0x311   : > { %2194 = vmatpush1.bf16.msra.mxu1 %v4791_v26  ;;  %2008 = vmatprep.mubr.bf16.mxu1 %v5132_v0 }
 0x312   : > { %2195 = vmatprep.subr.bf16.mxu1 %v4796_v27 }
 0x315   : > { %2196 = vmatpush1.bf16.msra.mxu1 %v4794_v28 }
 0x316   : > { %2197 = vmatprep.subr.bf16.mxu1 %v4799_v29 }
 0x318   : > { %4145 = vmatmul.mubr.msk.bf16.gmra.mrb[40].mxu1 %vm450_vm1, %v5332_v32  ;;  %v4814_v32 = vld [vmem:[#allocation2 + $0x494] ss:$8 sps:$4 sm:$0xff]  }
 0x319   : > { %2198 = vmatpush1.bf16.msra.mxu1 %v4797_v17  ;;  %2018 = vmatprep.mubr.bf16.mxu1 %v5132_v0 }
 0x31a   : > { %2199 = vmatprep.subr.bf16.mxu1 %v4802_v30 }
 0x31d   : > { %2200 = vmatpush1.bf16.msra.mxu1 %v4800_v31 }
 0x31e   : > { %2201 = vmatprep.subr.bf16.mxu1 %v4805_v33 }
 0x320   : > { %4146 = vmatmul.mubr.msk.bf16.gmra.mrb[44].mxu1 %vm450_vm1, %v5339_v39  ;;  %v4823_v39 = vld [vmem:[#allocation2 + $0x4c4] ss:$8 sps:$4 sm:$0xff]  }
 0x321   : > { %2202 = vmatpush1.bf16.msra.mxu1 %v4803_v24 }
 0x322   : > { %2203 = vmatprep.subr.bf16.mxu1 %v4808_v34 }
 0x325   : > { %2204 = vmatpush1.bf16.msra.mxu1 %v4806_v35 }
 0x326   : > { %2205 = vmatprep.subr.bf16.mxu1 %v4811_v36  ;;  %v4829_v36 = vld [vmem:[#allocation2 + $0x4e4] ss:$8 sps:$4 sm:$0xff]  }
 0x329   : > { %2206 = vmatpush1.bf16.msra.mxu1 %v4809_v37  ;;  %v4827_v37 = vld [vmem:[#allocation2 + $0x4e0] ss:$8 sps:$4 sm:$0xff]  }
 0x32a   : > { %2207 = vmatprep.subr.bf16.mxu1 %v4814_v32  ;;  %v4832_v32 = vld [vmem:[#allocation2 + $0x4f4] ss:$8 sps:$4 sm:$0xff]  }
 0x32d   : > { %2208 = vmatpush1.bf16.msra.mxu1 %v4812_v38  ;;  %v4830_v38 = vld [vmem:[#allocation2 + $0x4f0] ss:$8 sps:$4 sm:$0xff]  }
 0x32e   : > { %2209 = vmatprep.subr.bf16.mxu1 %v4817_v40  ;;  %v4833_v40 = vld [vmem:[#allocation2 + $0x500] ss:$8 sps:$4 sm:$0xff]  }
 0x331   : > { %2210 = vmatpush1.bf16.msra.mxu1 %v4815_v41  ;;  %v4835_v41 = vld [vmem:[#allocation2 + $0x504] ss:$8 sps:$4 sm:$0xff]  }
 0x332   : > { %2211 = vmatprep.subr.bf16.mxu1 %v4820_v42  ;;  %v4838_v42 = vld [vmem:[#allocation2 + $0x514] ss:$8 sps:$4 sm:$0xff]   ;;  %2508 = vmatprep.subr.bf16.mxu0 %v4835_v41 }
 0x335   : > { %2212 = vmatpush1.bf16.msra.mxu1 %v4818_v43  ;;  %v4836_v43 = vld [vmem:[#allocation2 + $0x510] ss:$8 sps:$4 sm:$0xff]  }
 0x336   : > { %2213 = vmatprep.subr.bf16.mxu1 %v4823_v39  ;;  %v4841_v39 = vld [vmem:[#allocation2 + $0x524] ss:$8 sps:$4 sm:$0xff]  }
 0x339   : > { %2214 = vmatpush1.bf16.msra.mxu1 %v4821_v44  ;;  %v4839_v44 = vld [vmem:[#allocation2 + $0x520] ss:$8 sps:$4 sm:$0xff]  }
 0x33a   : > { %2215 = vmatprep.subr.bf16.mxu1 %v4826_v45  ;;  %v4844_v45 = vld [vmem:[#allocation2 + $0x534] ss:$8 sps:$4 sm:$0xff]  }
 0x33d   : > { %2216 = vmatpush1.bf16.msra.mxu1 %v4824_v46  ;;  %v4842_v46 = vld [vmem:[#allocation2 + $0x530] ss:$8 sps:$4 sm:$0xff]  }
 0x33e   : > { %2217 = vmatprep.subr.bf16.mxu1 %v4829_v36 }
 0x341   : > { %2218 = vmatpush1.bf16.msra.mxu1 %v4827_v37 }
 0x342   : > { %2219 = vmatprep.subr.bf16.mxu1 %v4832_v32 }
 0x345   : > { %2220 = vmatpush1.bf16.msra.mxu1 %v4830_v38 }
 0x3bb   : > { %v1459_v54 = vpop.f32.mrb[16].mxu1 }
 0x3bc   : > { %v1461_v55 = vpop.f32.mrb[17].mxu1 }
 0x3bd   : > { %v1463_v57 = vpop.f32.mrb[18].mxu1 }
 0x3be   : > { %v1498_v59 = vpack.c.bf16 %v1463_v57, %v1459_v54  ;;  %v1465_v60 = vpop.f32.mrb[19].mxu1  ;;  %v4854_v54 = vld [vmem:[#allocation2 + $0x570] ss:$8 sps:$4 sm:$0xff]   ;;  %v4862_v57 = vld [vmem:[#allocation2 + $0x594] ss:$8 sps:$4 sm:$0xff]  }
 0x3bf   : > { %v1499_v61 = vpack.c.bf16 %v1465_v60, %v1461_v55  ;;  %v4859_v55 = vld [vmem:[#allocation2 + $0x584] ss:$8 sps:$4 sm:$0xff]   ;;  %v4863_v60 = vld [vmem:[#allocation2 + $0x5a0] ss:$8 sps:$4 sm:$0xff]  }
 0x3c0   : > { %v1535_v62 = vadd.bf16 %v1527_v56, %v1498_v59  ;;  %v4865_v59 = vld [vmem:[#allocation2 + $0x5a4] ss:$8 sps:$4 sm:$0xff]  }
 0x3c1   : > { %v1536_v63 = vadd.bf16 %v1534_v58, %v1499_v61  ;;  %v4868_v61 = vld [vmem:[#allocation2 + $0x5b4] ss:$8 sps:$4 sm:$0xff]  }
 0x3c2   : > { %v1543_v3 = vmax.bf16 %v5132_v0, %v1535_v62  ;;  %v4866_v62 = vld [vmem:[#allocation2 + $0x5b0] ss:$8 sps:$4 sm:$0xff]  }
 0x3c3   : > { %v1469_v1 = vpop.f32.mrb[20].mxu1  ;;  %v1544_v2 = vmax.bf16 %v5132_v0, %v1536_v63  ;;  %v4871_v63 = vld [vmem:[#allocation2 + $0x5c4] ss:$8 sps:$4 sm:$0xff]  }
 0x3c4   : > { %v1471_v4 = vpop.f32.mrb[21].mxu1 }
 0x3c5   : > { %v1473_v5 = vpop.f32.mrb[22].mxu1  ;;  %1776 = vmatprep.mubr.bf16.mxu0 %v1544_v2  ;;  %v4874_v2 = vld [vmem:[#allocation2 + $0x5d4] ss:$8 sps:$4 sm:$0xff]  }
 0x3c6   : > { %v1500_v6 = vpack.c.bf16 %v1473_v5, %v1469_v1  ;;  %v1475_v7 = vpop.f32.mrb[23].mxu1  ;;  %1777 = vmatmul.mubr.bf16.vlgmr.msra.gmra.mrb[32].mxu0 %v1543_v3  ;;  %v4869_v1 = vld [vmem:[#allocation2 + $0x5c0] ss:$8 sps:$4 sm:$0xff]   ;;  %v4872_v3 = vld [vmem:[#allocation2 + $0x5d0] ss:$8 sps:$4 sm:$0xff]  }
 0x3c7   : > { %v1501_v8 = vpack.c.bf16 %v1475_v7, %v1471_v4  ;;  %2509 = vmatpush1.bf16.msra.mxu0 %v4833_v40  ;;  %v4125_v4 = vld [vmem:[%s5751_s4 + $0x4] ss:$8 sm:$0x3] }
 0x3c8   : > { %v1537_v9 = vadd.bf16 %v1527_v56, %v1500_v6  ;;  %2510 = vmatprep.subr.bf16.mxu0 %v4838_v42  ;;  %v1831_v5 = vrot.slane %v4125_v4, %v5343_v22  ;;  %v1835_v6 = vrot.slane %v4125_v4, %v5348_v25 }
 0x3c9   : > { %v1538_v10 = vadd.bf16 %v1534_v58, %v1501_v8 }
 0x3ca   : > { %v1545_v14 = vmax.bf16 %v5132_v0, %v1537_v9  ;;  %v1838_v7 = vpack.c.bf16 %v1831_v5, %v1831_v5  ;;  %v1839_v8 = vpack.c.bf16 %v1835_v6, %v1835_v6 }
 0x3cb   : > { %v1479_v11 = vpop.f32.mrb[24].mxu1  ;;  %v1546_v12 = vmax.bf16 %v5132_v0, %v1538_v10  ;;  %2511 = vmatpush1.bf16.msra.mxu0 %v4836_v43 }
 0x3cc   : > { %v1481_v13 = vpop.f32.mrb[25].mxu1  ;;  %2512 = vmatprep.subr.bf16.mxu0 %v4841_v39  ;;  %v1841_v9 = vpack.i.b16 %v1838_v7, %v1838_v7  ;;  %v1848_v10 = vpack.i.b16 %v1839_v8, %v1839_v8 }
 0x3cd   : > { %v1483_v15 = vpop.f32.mrb[26].mxu1  ;;  %1786 = vmatprep.mubr.bf16.mxu0 %v1546_v12 }
 0x3ce   : > { %v1502_v16 = vpack.c.bf16 %v1483_v15, %v1479_v11  ;;  %v1485_v18 = vpop.f32.mrb[27].mxu1  ;;  %1787 = vmatmul.mubr.bf16.gmra.mrb[36].mxu0 %v1545_v14  ;;  %v1853_v15 = vrot.slane %v1848_v10, %v5343_v22 }
 0x3cf   : > { %v1503_v19 = vpack.c.bf16 %v1485_v18, %v1481_v13  ;;  %2513 = vmatpush1.bf16.msra.mxu0 %v4839_v44  ;;  %v1846_v13 = vrot.slane %v1841_v9, %v5343_v22 }
 0x3d0   : > { %v1539_v20 = vadd.bf16 %v1527_v56, %v1502_v16  ;;  %2514 = vmatprep.subr.bf16.mxu0 %v4844_v45 }
 0x3d1   : > { %v1540_v21 = vadd.bf16 %v1534_v58, %v1503_v19 }
 0x3d2   : > { %v1547_v28 = vmax.bf16 %v5132_v0, %v1539_v20 }
 0x3d3   : > { %v1489_v23 = vpop.f32.mrb[28].mxu1  ;;  %v1548_v26 = vmax.bf16 %v5132_v0, %v1540_v21  ;;  %2515 = vmatpush1.bf16.msra.mxu0 %v4842_v46 }
 0x3d4   : > { %v1491_v27 = vpop.f32.mrb[29].mxu1  ;;  %2516 = vmatprep.subr.bf16.mxu0 %v4847_v47 }
 0x3d5   : > { %v1493_v29 = vpop.f32.mrb[30].mxu1  ;;  %1796 = vmatprep.mubr.bf16.mxu0 %v1548_v26 }
 0x3d6   : > { %v1504_v17 = vpack.c.bf16 %v1493_v29, %v1489_v23  ;;  %v1495_v30 = vpop.f32.mrb[31].mxu1  ;;  %1797 = vmatmul.mubr.bf16.gmra.mrb[40].mxu0 %v1547_v28 }
 0x3d7   : > { %v1505_v31 = vpack.c.bf16 %v1495_v30, %v1491_v27  ;;  %2517 = vmatpush1.bf16.msra.mxu0 %v4845_v48 }
 0x3d8   : > { %v1541_v33 = vadd.bf16 %v1527_v56, %v1504_v17  ;;  %2518 = vmatprep.subr.bf16.mxu0 %v4850_v49  ;;  %v4857_v56 = vld [vmem:[#allocation2 + $0x580] ss:$8 sps:$4 sm:$0xff]  }
 0x3d9   : > { %v1542_v24 = vadd.bf16 %v1534_v58, %v1505_v31  ;;  %v4860_v58 = vld [vmem:[#allocation2 + $0x590] ss:$8 sps:$4 sm:$0xff]  }
 0x3da   : > { %v1549_v35 = vmax.bf16 %v5132_v0, %v1541_v33 }
 0x3db   : > { %v1550_v34 = vmax.bf16 %v5132_v0, %v1542_v24  ;;  %2519 = vmatpush1.bf16.msra.mxu0 %v4848_v50 }
 0x3dc   : > { %2520 = vmatprep.subr.bf16.mxu0 %v4853_v51 }
 0x3dd   : > { %1806 = vmatprep.mubr.bf16.mxu0 %v1550_v34 }
 0x3de   : > { %1807 = vmatmul.mubr.bf16.gmra.mrb[44].mxu0 %v1549_v35 }
 0x3df   : > { %2521 = vmatpush1.bf16.msra.mxu0 %v4851_v52 }
 0x3e0   : > { %2522 = vmatprep.subr.bf16.mxu0 %v4856_v53 }
 0x3e3   : > { %2523 = vmatpush1.bf16.msra.mxu0 %v4854_v54 }
 0x3e4   : > { %2524 = vmatprep.subr.bf16.mxu0 %v4859_v55  ;;  %v4877_v55 = vld [vmem:[#allocation2 + $0x5e4] ss:$8 sps:$4 sm:$0xff]  }
 0x3e7   : > { %2525 = vmatpush1.bf16.msra.mxu0 %v4857_v56  ;;  %v4875_v56 = vld [vmem:[#allocation2 + $0x5e0] ss:$8 sps:$4 sm:$0xff]  }
 0x3e8   : > { %2526 = vmatprep.subr.bf16.mxu0 %v4862_v57  ;;  %v4880_v57 = vld [vmem:[#allocation2 + $0x5f4] ss:$8 sps:$4 sm:$0xff]  }
 0x3eb   : > { %2527 = vmatpush1.bf16.msra.mxu0 %v4860_v58  ;;  %v4878_v58 = vld [vmem:[#allocation2 + $0x5f0] ss:$8 sps:$4 sm:$0xff]  }
 0x3ec   : > { %2528 = vmatprep.subr.bf16.mxu0 %v4865_v59  ;;  %v4883_v59 = vld [vmem:[#allocation2 + $0x604] ss:$8 sps:$4 sm:$0xff]  }
 0x3ef   : > { %2529 = vmatpush1.bf16.msra.mxu0 %v4863_v60  ;;  %v4179_v60 = vld [vmem:[%s5751_s4 + $0x5] ss:$8 sm:$0x3] }
 0x3f0   : > { %2530 = vmatprep.subr.bf16.mxu0 %v4868_v61  ;;  %v2276_v61 = vrot.slane %v4179_v60, %v5343_v22 }
 0x3f3   : > { %2531 = vmatpush1.bf16.msra.mxu0 %v4866_v62  ;;  %v2280_v62 = vrot.slane %v4179_v60, %v5348_v25 }
 0x3f4   : > { %2532 = vmatprep.subr.bf16.mxu0 %v4871_v63  ;;  %v2283_v63 = vpack.c.bf16 %v2276_v61, %v2276_v61  ;;  %v4904_v61 = vld [vmem:[#allocation2 + $0x674] ss:$8 sps:$4 sm:$0xff]  }
 0x3f7   : > { %2533 = vmatpush1.bf16.msra.mxu0 %v4869_v1  ;;  %v2284_v1 = vpack.c.bf16 %v2280_v62, %v2280_v62  ;;  %v4902_v62 = vld [vmem:[#allocation2 + $0x670] ss:$8 sps:$4 sm:$0xff]  }
 0x3f8   : > { %2534 = vmatprep.subr.bf16.mxu0 %v4874_v2  ;;  %v2286_v2 = vpack.i.b16 %v2283_v63, %v2283_v63  ;;  %v4907_v63 = vld [vmem:[#allocation2 + $0x684] ss:$8 sps:$4 sm:$0xff]  }
 0x3fa   : > { %v2291_v6 = vrot.slane %v2286_v2, %v5343_v22  ;;  %v4910_v2 = vld [vmem:[#allocation2 + $0x694] ss:$8 sps:$4 sm:$0xff]  }
 0x3fb   : > { %2535 = vmatpush1.bf16.msra.mxu0 %v4872_v3  ;;  %v2293_v3 = vpack.i.b16 %v2284_v1, %v2284_v1  ;;  %v4905_v1 = vld [vmem:[#allocation2 + $0x680] ss:$8 sps:$4 sm:$0xff]  }
 0x3fc   : > { %2536 = vmatprep.subr.bf16.mxu0 %v4877_v55 }
 0x3fd   : > { %v5467_v8 = vrot.slane %v2293_v3, %v5343_v22  ;;  %v4908_v3 = vld [vmem:[#allocation2 + $0x690] ss:$8 sps:$4 sm:$0xff]  }
 0x3ff   : > { %2537 = vmatpush1.bf16.msra.mxu0 %v4875_v56  ;;  %v4901_v56 = vld [vmem:[#allocation2 + $0x664] ss:$8 sps:$4 sm:$0xff]  }
 0x400   : > { %2538 = vmatprep.subr.bf16.mxu0 %v4880_v57 }
 0x403   : > { %2539 = vmatpush1.bf16.msra.mxu0 %v4878_v58 }
 0x404   : > { %2827 = vmatprep.subr.bf16.mxu0 %v4883_v59  ;;  %v4899_v59 = vld [vmem:[#allocation2 + $0x660] ss:$8 sps:$4 sm:$0xff]  }
 0x499   : > { %v1778_v11 = vpop.f32.mrb[32].mxu0 }
 0x49a   : > { %v1780_v12 = vpop.f32.mrb[33].mxu0 }
 0x49b   : > { %v1782_v14 = vpop.f32.mrb[34].mxu0 }
 0x49c   : > { %v1817_v16 = vpack.c.bf16 %v1782_v14, %v1778_v11  ;;  %v1784_v18 = vpop.f32.mrb[35].mxu0 }
 0x49d   : > { %v1818_v19 = vpack.c.bf16 %v1784_v18, %v1780_v12 }
 0x49e   : > { %v1854_v20 = vadd.bf16 %v1846_v13, %v1817_v16  ;;  %v4881_v16 = vld [vmem:[#allocation2 + $0x600] ss:$8 sps:$4 sm:$0xff]  }
 0x49f   : > { %v1855_v21 = vadd.bf16 %v1853_v15, %v1818_v19 }
 0x4a0   : > { %v1862_v27 = vmax.bf16 %v5132_v0, %v1854_v20  ;;  %v4886_v20 = vld [vmem:[#allocation2 + $0x614] ss:$8 sps:$4 sm:$0xff]  }
 0x4a1   : > { %v1788_v23 = vpop.f32.mrb[36].mxu0  ;;  %v1863_v26 = vmax.bf16 %v5132_v0, %v1855_v21 }
 0x4a2   : > { %v1790_v28 = vpop.f32.mrb[37].mxu0 }
 0x4a3   : > { %v1792_v29 = vpop.f32.mrb[38].mxu0  ;;  %2221 = vmatprep.mubr.bf16.mxu1 %v1863_v26 }
 0x4a4   : > { %v1819_v17 = vpack.c.bf16 %v1792_v29, %v1788_v23  ;;  %v1794_v30 = vpop.f32.mrb[39].mxu0  ;;  %2222 = vmatmul.mubr.bf16.vlgmr.msra.gmra.mrb[32].mxu1 %v1862_v27 }
 0x4a5   : > { %v1820_v31 = vpack.c.bf16 %v1794_v30, %v1790_v28  ;;  %v4884_v28 = vld [vmem:[#allocation2 + $0x610] ss:$8 sps:$4 sm:$0xff]  }
 0x4a6   : > { %v1856_v33 = vadd.bf16 %v1846_v13, %v1819_v17  ;;  %v4889_v17 = vld [vmem:[#allocation2 + $0x624] ss:$8 sps:$4 sm:$0xff]  }
 0x4a7   : > { %v1857_v24 = vadd.bf16 %v1853_v15, %v1820_v31 }
 0x4a8   : > { %v1864_v37 = vmax.bf16 %v5132_v0, %v1856_v33 }
 0x4a9   : > { %v1798_v34 = vpop.f32.mrb[40].mxu0  ;;  %v1865_v35 = vmax.bf16 %v5132_v0, %v1857_v24  ;;  %v4887_v24 = vld [vmem:[#allocation2 + $0x620] ss:$8 sps:$4 sm:$0xff]  }
 0x4aa   : > { %v1800_v36 = vpop.f32.mrb[41].mxu0 }
 0x4ab   : > { %v1802_v32 = vpop.f32.mrb[42].mxu0  ;;  %2231 = vmatprep.mubr.bf16.mxu1 %v1865_v35 }
 0x4ac   : > { %v1821_v38 = vpack.c.bf16 %v1802_v32, %v1798_v34  ;;  %v1804_v40 = vpop.f32.mrb[43].mxu0  ;;  %2232 = vmatmul.mubr.bf16.gmra.mrb[36].mxu1 %v1864_v37 }
 0x4ad   : > { %v1822_v41 = vpack.c.bf16 %v1804_v40, %v1800_v36  ;;  %v4892_v36 = vld [vmem:[#allocation2 + $0x634] ss:$8 sps:$4 sm:$0xff]  }
 0x4ae   : > { %v1858_v42 = vadd.bf16 %v1846_v13, %v1821_v38 }
 0x4af   : > { %v1859_v43 = vadd.bf16 %v1853_v15, %v1822_v41  ;;  %v4890_v41 = vld [vmem:[#allocation2 + $0x630] ss:$8 sps:$4 sm:$0xff]  }
 0x4b0   : > { %v1866_v46 = vmax.bf16 %v5132_v0, %v1858_v42 }
 0x4b1   : > { %v1808_v39 = vpop.f32.mrb[44].mxu0  ;;  %v1867_v44 = vmax.bf16 %v5132_v0, %v1859_v43  ;;  %v4895_v43 = vld [vmem:[#allocation2 + $0x644] ss:$8 sps:$4 sm:$0xff]  }
 0x4b2   : > { %v1810_v45 = vpop.f32.mrb[45].mxu0 }
 0x4b3   : > { %v1812_v47 = vpop.f32.mrb[46].mxu0  ;;  %2241 = vmatprep.mubr.bf16.mxu1 %v1867_v44 }
 0x4b4   : > { %v1823_v48 = vpack.c.bf16 %v1812_v47, %v1808_v39  ;;  %v1814_v49 = vpop.f32.mrb[47].mxu0  ;;  %2242 = vmatmul.mubr.bf16.gmra.mrb[40].mxu1 %v1866_v46  ;;  %v4893_v46 = vld [vmem:[#allocation2 + $0x640] ss:$8 sps:$4 sm:$0xff]  }
 0x4b5   : > { %v1824_v50 = vpack.c.bf16 %v1814_v49, %v1810_v45  ;;  %v4898_v49 = vld [vmem:[#allocation2 + $0x654] ss:$8 sps:$4 sm:$0xff]  }
 0x4b6   : > { %v1860_v51 = vadd.bf16 %v1846_v13, %v1823_v48 }
 0x4b7   : > { %v1861_v52 = vadd.bf16 %v1853_v15, %v1824_v50 }
 0x4b8   : > { %v1868_v54 = vmax.bf16 %v5132_v0, %v1860_v51 }
 0x4b9   : > { %v1869_v53 = vmax.bf16 %v5132_v0, %v1861_v52 }
 0x4bb   : > { %2251 = vmatprep.mubr.bf16.mxu1 %v1869_v53 }
 0x4bc   : > { %2252 = vmatmul.mubr.bf16.gmra.mrb[44].mxu1 %v1868_v54  ;;  %v4896_v54 = vld [vmem:[#allocation2 + $0x650] ss:$8 sps:$4 sm:$0xff]  }
 0x577   : > { %v2223_v4 = vpop.f32.mrb[32].mxu1 }
 0x578   : > { %v2225_v5 = vpop.f32.mrb[33].mxu1 }
 0x579   : > { %v2227_v7 = vpop.f32.mrb[34].mxu1 }
 0x57a   : > { %v2262_v9 = vpack.c.bf16 %v2227_v7, %v2223_v4  ;;  %v2229_v10 = vpop.f32.mrb[35].mxu1  ;;  %v4913_v4 = vld [vmem:[#allocation2 + $0x6a4] ss:$8 sps:$4 sm:$0xff]   ;;  %v4914_v7 = vld [vmem:[#allocation2 + $0x6b0] ss:$8 sps:$4 sm:$0xff]  }
 0x57b   : > { %v2263_v11 = vpack.c.bf16 %v2229_v10, %v2225_v5  ;;  %v4911_v5 = vld [vmem:[#allocation2 + $0x6a0] ss:$8 sps:$4 sm:$0xff]   ;;  %v4922_v10 = vld [vmem:[#allocation2 + $0x6d4] ss:$8 sps:$4 sm:$0xff]  }
 0x57c   : > { %v2299_v12 = vadd.bf16 %v2291_v6, %v2262_v9  ;;  %v4917_v9 = vld [vmem:[#allocation2 + $0x6c0] ss:$8 sps:$4 sm:$0xff]  }
 0x57d   : > { %v2300_v13 = vadd.bf16 %v5467_v8, %v2263_v11  ;;  %v4920_v11 = vld [vmem:[#allocation2 + $0x6d0] ss:$8 sps:$4 sm:$0xff]  }
 0x57e   : > { %v2307_v18 = vmax.bf16 %v5132_v0, %v2299_v12  ;;  %v4925_v12 = vld [vmem:[#allocation2 + $0x6e4] ss:$8 sps:$4 sm:$0xff]  }
 0x57f   : > { %v2233_v14 = vpop.f32.mrb[36].mxu1  ;;  %v2308_v15 = vmax.bf16 %v5132_v0, %v2300_v13  ;;  %v4923_v13 = vld [vmem:[#allocation2 + $0x6e0] ss:$8 sps:$4 sm:$0xff]  }
 0x580   : > { %v2235_v19 = vpop.f32.mrb[37].mxu1 }
 0x581   : > { %v2237_v21 = vpop.f32.mrb[38].mxu1  ;;  %2540 = vmatprep.mubr.bf16.mxu0 %v2308_v15  ;;  %v4926_v15 = vld [vmem:[#allocation2 + $0x6f0] ss:$8 sps:$4 sm:$0xff]  }
 0x582   : > { %v2264_v23 = vpack.c.bf16 %v2237_v21, %v2233_v14  ;;  %v2239_v26 = vpop.f32.mrb[39].mxu1  ;;  %2541 = vmatmul.mubr.bf16.vlgmr.msra.gmra.mrb[48].mxu0 %v2307_v18  ;;  %v4928_v14 = vld [vmem:[#allocation2 + $0x6f4] ss:$8 sps:$4 sm:$0xff]   ;;  %v4931_v18 = vld [vmem:[#allocation2 + $0x704] ss:$8 sps:$4 sm:$0xff]  }
 0x583   : > { %v2265_v27 = vpack.c.bf16 %v2239_v26, %v2235_v19  ;;  %2828 = vmatpush1.bf16.msra.mxu0 %v4881_v16  ;;  %v4929_v16 = vld [vmem:[#allocation2 + $0x700] ss:$8 sps:$4 sm:$0xff]   ;;  %v4934_v19 = vld [vmem:[#allocation2 + $0x714] ss:$8 sps:$4 sm:$0xff]   ;;  %3146 = vmatprep.subr.bf16.mxu1 %v4931_v18  ;;  %v4937_v21 = vld [vmem:[#allocation2 + $0x724] ss:$8 sps:$4 sm:$0xff]  }
 0x584   : > { %v2301_v29 = vadd.bf16 %v2291_v6, %v2264_v23  ;;  %2829 = vmatprep.subr.bf16.mxu0 %v4886_v20  ;;  %3147 = vmatpush1.bf16.msra.mxu1 %v4929_v16  ;;  %v4932_v20 = vld [vmem:[#allocation2 + $0x710] ss:$8 sps:$4 sm:$0xff]   ;;  %v4935_v23 = vld [vmem:[#allocation2 + $0x720] ss:$8 sps:$4 sm:$0xff]   ;;  %v4940_v26 = vld [vmem:[#allocation2 + $0x734] ss:$8 sps:$4 sm:$0xff]  }
 0x585   : > { %v2302_v30 = vadd.bf16 %v5467_v8, %v2265_v27  ;;  %3148 = vmatprep.subr.bf16.mxu1 %v4934_v19  ;;  %v4938_v27 = vld [vmem:[#allocation2 + $0x730] ss:$8 sps:$4 sm:$0xff]  }
 0x586   : > { %v2309_v35 = vmax.bf16 %v5132_v0, %v2301_v29  ;;  %v4941_v29 = vld [vmem:[#allocation2 + $0x740] ss:$8 sps:$4 sm:$0xff]  }
 0x587   : > { %v2243_v31 = vpop.f32.mrb[40].mxu1  ;;  %v2310_v33 = vmax.bf16 %v5132_v0, %v2302_v30  ;;  %2830 = vmatpush1.bf16.msra.mxu0 %v4884_v28  ;;  %v4943_v28 = vld [vmem:[#allocation2 + $0x744] ss:$8 sps:$4 sm:$0xff]   ;;  %v4944_v30 = vld [vmem:[#allocation2 + $0x750] ss:$8 sps:$4 sm:$0xff]  }
 0x588   : > { %v2245_v34 = vpop.f32.mrb[41].mxu1  ;;  %2831 = vmatprep.subr.bf16.mxu0 %v4889_v17  ;;  %3149 = vmatpush1.bf16.msra.mxu1 %v4932_v20  ;;  %v4946_v17 = vld [vmem:[#allocation2 + $0x754] ss:$8 sps:$4 sm:$0xff]  }
 0x589   : > { %v2247_v37 = vpop.f32.mrb[42].mxu1  ;;  %2550 = vmatprep.mubr.bf16.mxu0 %v2310_v33  ;;  %3150 = vmatprep.subr.bf16.mxu1 %v4937_v21  ;;  %v4947_v33 = vld [vmem:[#allocation2 + $0x760] ss:$8 sps:$4 sm:$0xff]  }
 0x58a   : > { %v2266_v32 = vpack.c.bf16 %v2247_v37, %v2243_v31  ;;  %v2249_v38 = vpop.f32.mrb[43].mxu1  ;;  %2551 = vmatmul.mubr.bf16.gmra.mrb[52].mxu0 %v2309_v35  ;;  %v4949_v31 = vld [vmem:[#allocation2 + $0x764] ss:$8 sps:$4 sm:$0xff]   ;;  %v4958_v37 = vld [vmem:[#allocation2 + $0x794] ss:$8 sps:$4 sm:$0xff]  }
 0x58b   : > { %v2267_v40 = vpack.c.bf16 %v2249_v38, %v2245_v34  ;;  %2832 = vmatpush1.bf16.msra.mxu0 %v4887_v24  ;;  %v4952_v24 = vld [vmem:[#allocation2 + $0x774] ss:$8 sps:$4 sm:$0xff]   ;;  %v4950_v34 = vld [vmem:[#allocation2 + $0x770] ss:$8 sps:$4 sm:$0xff]   ;;  %v4955_v35 = vld [vmem:[#allocation2 + $0x784] ss:$8 sps:$4 sm:$0xff]  }
 0x58c   : > { %v2303_v42 = vadd.bf16 %v2291_v6, %v2266_v32  ;;  %2833 = vmatprep.subr.bf16.mxu0 %v4892_v36  ;;  %3151 = vmatpush1.bf16.msra.mxu1 %v4935_v23  ;;  %v4953_v36 = vld [vmem:[#allocation2 + $0x780] ss:$8 sps:$4 sm:$0xff]   ;;  %v4956_v32 = vld [vmem:[#allocation2 + $0x790] ss:$8 sps:$4 sm:$0xff]   ;;  %v4961_v38 = vld [vmem:[#allocation2 + $0x7a4] ss:$8 sps:$4 sm:$0xff]  }
 0x58d   : > { %v2304_v39 = vadd.bf16 %v5467_v8, %v2267_v40  ;;  %3152 = vmatprep.subr.bf16.mxu1 %v4940_v26  ;;  %v4959_v40 = vld [vmem:[#allocation2 + $0x7a0] ss:$8 sps:$4 sm:$0xff]  }
 0x58e   : > { %v2311_v48 = vmax.bf16 %v5132_v0, %v2303_v42  ;;  %v4962_v42 = vld [vmem:[#allocation2 + $0x7b0] ss:$8 sps:$4 sm:$0xff]  }
 0x58f   : > { %v2253_v44 = vpop.f32.mrb[44].mxu1  ;;  %v2312_v45 = vmax.bf16 %v5132_v0, %v2304_v39  ;;  %2834 = vmatpush1.bf16.msra.mxu0 %v4890_v41  ;;  %v4964_v41 = vld [vmem:[#allocation2 + $0x7b4] ss:$8 sps:$4 sm:$0xff]   ;;  %v4965_v39 = vld [vmem:[#allocation2 + $0x7c0] ss:$8 sps:$4 sm:$0xff]  }
 0x590   : > { %v2255_v47 = vpop.f32.mrb[45].mxu1  ;;  %2835 = vmatprep.subr.bf16.mxu0 %v4895_v43  ;;  %3153 = vmatpush1.bf16.msra.mxu1 %v4938_v27  ;;  %v4967_v43 = vld [vmem:[#allocation2 + $0x7c4] ss:$8 sps:$4 sm:$0xff]  }
 0x591   : > { %v2257_v50 = vpop.f32.mrb[46].mxu1  ;;  %2560 = vmatprep.mubr.bf16.mxu0 %v2312_v45  ;;  %3154 = vmatprep.subr.bf16.mxu1 %v4943_v28  ;;  %v4968_v45 = vld [vmem:[#allocation2 + $0x7d0] ss:$8 sps:$4 sm:$0xff]  }
 0x592   : > { %v2268_v51 = vpack.c.bf16 %v2257_v50, %v2253_v44  ;;  %v2259_v52 = vpop.f32.mrb[47].mxu1  ;;  %2561 = vmatmul.mubr.bf16.gmra.mrb[56].mxu0 %v2311_v48  ;;  %v4970_v44 = vld [vmem:[#allocation2 + $0x7d4] ss:$8 sps:$4 sm:$0xff]  }
 0x593   : > { %v2269_v53 = vpack.c.bf16 %v2259_v52, %v2255_v47  ;;  %2836 = vmatpush1.bf16.msra.mxu0 %v4893_v46  ;;  %v4212_v46 = vld [vmem:[%s5751_s4 + $0x6] ss:$8 sm:$0x3] }
 0x594   : > { %v2305_v55 = vadd.bf16 %v2291_v6, %v2268_v51  ;;  %2837 = vmatprep.subr.bf16.mxu0 %v4898_v49  ;;  %v4916_v6 = vld [vmem:[#allocation2 + $0x6b4] ss:$8 sps:$4 sm:$0xff]   ;;  %3155 = vmatpush1.bf16.msra.mxu1 %v4941_v29  ;;  %v2595_v47 = vrot.slane %v4212_v46, %v5343_v22  ;;  %v2599_v48 = vrot.slane %v4212_v46, %v5348_v25 }
 0x595   : > { %v2306_v57 = vadd.bf16 %v5467_v8, %v2269_v53  ;;  %v4919_v8 = vld [vmem:[#allocation2 + $0x6c4] ss:$8 sps:$4 sm:$0xff]   ;;  %3156 = vmatprep.subr.bf16.mxu1 %v4946_v17  ;;  %v5000_v46 = vld [vmem:[%s5752_s5 + $0x18] sm:$0xff]  }
 0x596   : > { %v2313_v60 = vmax.bf16 %v5132_v0, %v2305_v55  ;;  %v2602_v49 = vpack.c.bf16 %v2595_v47, %v2595_v47  ;;  %v2603_v50 = vpack.c.bf16 %v2599_v48, %v2599_v48  ;;  %v5001_v47 = vld [vmem:[%s5752_s5 + $0x60] sm:$0xff]  }
 0x597   : > { %v2314_v58 = vmax.bf16 %v5132_v0, %v2306_v57  ;;  %2838 = vmatpush1.bf16.msra.mxu0 %v4896_v54  ;;  %v5002_v48 = vld [vmem:[%s5752_s5 + $0x20] sm:$0xff]  }
 0x598   : > { %2839 = vmatprep.subr.bf16.mxu0 %v4901_v56  ;;  %3157 = vmatpush1.bf16.msra.mxu1 %v4944_v30  ;;  %v2605_v51 = vpack.i.b16 %v2602_v49, %v2602_v49  ;;  %v2612_v52 = vpack.i.b16 %v2603_v50, %v2603_v50  ;;  %v5003_v49 = vld [vmem:[%s5752_s5 + $0x68] sm:$0xff]  }
 0x599   : > { %2570 = vmatprep.mubr.bf16.mxu0 %v2314_v58  ;;  %3158 = vmatprep.subr.bf16.mxu1 %v4949_v31  ;;  %v5004_v50 = vld [vmem:[%s5752_s5 + $0x28] sm:$0xff]  }
 0x59a   : > { %2571 = vmatmul.mubr.bf16.gmra.mrb[60].mxu0 %v2313_v60  ;;  %v2610_v55 = vrot.slane %v2605_v51, %v5343_v22  ;;  %v2617_v57 = vrot.slane %v2612_v52, %v5343_v22  ;;  %v4245_v51 = vld [vmem:[%s5751_s4 + $0x7] ss:$8 sm:$0x3] }
 0x59b   : > { %2840 = vmatpush1.bf16.msra.mxu0 %v4899_v59  ;;  %v2914_v52 = vrot.slane %v4245_v51, %v5343_v22 }
 0x59c   : > { %2841 = vmatprep.subr.bf16.mxu0 %v4904_v61  ;;  %3159 = vmatpush1.bf16.msra.mxu1 %v4947_v33 }
 0x59d   : > { %3160 = vmatprep.subr.bf16.mxu1 %v4952_v24 }
 0x59f   : > { %2842 = vmatpush1.bf16.msra.mxu0 %v4902_v62 }
 0x5a0   : > { %2843 = vmatprep.subr.bf16.mxu0 %v4907_v63  ;;  %3161 = vmatpush1.bf16.msra.mxu1 %v4950_v34 }
 0x5a1   : > { %3162 = vmatprep.subr.bf16.mxu1 %v4955_v35  ;;  %v4973_v35 = vld [vmem:[#allocation2 + $0x7e4] ss:$8 sps:$4 sm:$0xff]  }
 0x5a3   : > { %2844 = vmatpush1.bf16.msra.mxu0 %v4905_v1 }
 0x5a4   : > { %2845 = vmatprep.subr.bf16.mxu0 %v4910_v2  ;;  %3163 = vmatpush1.bf16.msra.mxu1 %v4953_v36  ;;  %v4971_v36 = vld [vmem:[#allocation2 + $0x7e0] ss:$8 sps:$4 sm:$0xff]  }
 0x5a5   : > { %3164 = vmatprep.subr.bf16.mxu1 %v4958_v37  ;;  %v4976_v37 = vld [vmem:[#allocation2 + $0x7f4] ss:$8 sps:$4 sm:$0xff]  }
 0x5a7   : > { %2846 = vmatpush1.bf16.msra.mxu0 %v4908_v3 }
 0x5a8   : > { %2847 = vmatprep.subr.bf16.mxu0 %v4913_v4  ;;  %3165 = vmatpush1.bf16.msra.mxu1 %v4956_v32  ;;  %v4974_v32 = vld [vmem:[#allocation2 + $0x7f0] ss:$8 sps:$4 sm:$0xff]  }
 0x5a9   : > { %3166 = vmatprep.subr.bf16.mxu1 %v4961_v38  ;;  %v4977_v38 = vld [vmem:[%s5754_s7 + $0x40] sm:$0xff]  }
 0x5ab   : > { %2848 = vmatpush1.bf16.msra.mxu0 %v4911_v5 }
 0x5ac   : > { %2849 = vmatprep.subr.bf16.mxu0 %v4916_v6  ;;  %3167 = vmatpush1.bf16.msra.mxu1 %v4959_v40  ;;  %v4993_v40 = vld [vmem:[%s5752_s5 + $0x40] sm:$0xff]  }
 0x5ad   : > { %3168 = vmatprep.subr.bf16.mxu1 %v4964_v41  ;;  %v4994_v41 = vld [vmem:[%s5752_s5] sm:$0xff]  }
 0x5af   : > { %2850 = vmatpush1.bf16.msra.mxu0 %v4914_v7 }
 0x5b0   : > { %2851 = vmatprep.subr.bf16.mxu0 %v4919_v8  ;;  %3169 = vmatpush1.bf16.msra.mxu1 %v4962_v42  ;;  %v4995_v42 = vld [vmem:[%s5752_s5 + $0x48] sm:$0xff]  }
 0x5b1   : > { %3170 = vmatprep.subr.bf16.mxu1 %v4967_v43  ;;  %v4996_v43 = vld [vmem:[%s5752_s5 + $0x8] sm:$0xff]  }
 0x5b3   : > { %2852 = vmatpush1.bf16.msra.mxu0 %v4917_v9 }
 0x5b4   : > { %2853 = vmatprep.subr.bf16.mxu0 %v4922_v10  ;;  %3171 = vmatpush1.bf16.msra.mxu1 %v4965_v39  ;;  %v4997_v39 = vld [vmem:[%s5752_s5 + $0x50] sm:$0xff]  }
 0x5b5   : > { %3172 = vmatprep.subr.bf16.mxu1 %v4970_v44  ;;  %v4998_v44 = vld [vmem:[%s5752_s5 + $0x10] sm:$0xff]  }
 0x5b7   : > { %2854 = vmatpush1.bf16.msra.mxu0 %v4920_v11 }
 0x5b8   : > { %2855 = vmatprep.subr.bf16.mxu0 %v4925_v12  ;;  %3173 = vmatpush1.bf16.msra.mxu1 %v4968_v45  ;;  %v4999_v45 = vld [vmem:[%s5752_s5 + $0x58] sm:$0xff]  }
 0x5b9   : > { %3174 = vmatprep.subr.bf16.mxu1 %v4973_v35 }
 0x5bb   : > { %2856 = vmatpush1.bf16.msra.mxu0 %v4923_v13 }
 0x5bc   : > { %2857 = vmatprep.subr.bf16.mxu0 %v4928_v14  ;;  %3175 = vmatpush1.bf16.msra.mxu1 %v4971_v36 }
 0x5bd   : > { %3176 = vmatprep.subr.bf16.mxu1 %v4976_v37 }
 0x5bf   : > { %2858 = vmatpush1.bf16.msra.mxu0 %v4926_v15 }
 0x5c0   : > { %3177 = vmatpush1.bf16.msra.mxu1 %v4974_v32  ;;  %4366 = vmatprep.subr.bf16.mxu0 %v4993_v40  ;;  %v4986_v32 = vld [vmem:[%s5754_s7 + $0x20] sm:$0xff]  }
 0x5c1   : > { %4406 = vmatprep.subr.bf16.mxu1 %v4977_v38 }
 0x655   : > { %v2542_v53 = vpop.f32.mrb[48].mxu0 }
 0x656   : > { %v2544_v54 = vpop.f32.mrb[49].mxu0 }
 0x657   : > { %v2546_v56 = vpop.f32.mrb[50].mxu0 }
 0x658   : > { %v2581_v58 = vpack.c.bf16 %v2546_v56, %v2542_v53  ;;  %v2548_v59 = vpop.f32.mrb[51].mxu0  ;;  %v2918_v53 = vrot.slane %v4245_v51, %v5348_v25 }
 0x659   : > { %v2582_v60 = vpack.c.bf16 %v2548_v59, %v2544_v54  ;;  %v2921_v54 = vpack.c.bf16 %v2914_v52, %v2914_v52  ;;  %v4991_v52 = vld [vmem:[%s5754_s7 + $0x78] sm:$0xff]  }
 0x65a   : > { %v2618_v61 = vadd.bf16 %v2610_v55, %v2581_v58 }
 0x65b   : > { %v2619_v62 = vadd.bf16 %v2617_v57, %v2582_v60  ;;  %v2924_v56 = vpack.i.b16 %v2921_v54, %v2921_v54  ;;  %v5005_v54 = vld [vmem:[%s5752_s5 + $0x70] sm:$0xff]  }
 0x65c   : > { %v2626_v2 = vmax.bf16 %v5132_v0, %v2618_v61 }
 0x65d   : > { %v2552_v63 = vpop.f32.mrb[52].mxu0  ;;  %v2627_v1 = vmax.bf16 %v5132_v0, %v2619_v62  ;;  %v2929_v60 = vrot.slane %v2924_v56, %v5343_v22  ;;  %v5007_v56 = vld [vmem:[%s5752_s5 + $0x78] sm:$0xff]  }
 0x65e   : > { %v2554_v3 = vpop.f32.mrb[53].mxu0 }
 0x65f   : > { %v2556_v4 = vpop.f32.mrb[54].mxu0  ;;  %2859 = vmatprep.mubr.bf16.mxu0 %v2627_v1 }
 0x660   : > { %v2583_v5 = vpack.c.bf16 %v2556_v4, %v2552_v63  ;;  %v2558_v6 = vpop.f32.mrb[55].mxu0  ;;  %2860 = vmatmul.mubr.bf16.vlgmr.msra.gmra.mrb[64].mxu0 %v2626_v2 }
 0x661   : > { %v2584_v7 = vpack.c.bf16 %v2558_v6, %v2554_v3  ;;  %4367 = vmatpush3.bf16.msra.mxu0 %v4994_v41  ;;  %v4987_v41 = vld [vmem:[%s5754_s7 + $0x68] sm:$0xff]  }
 0x662   : > { %v2620_v8 = vadd.bf16 %v2610_v55, %v2583_v5  ;;  %4368 = vmatprep.subr.bf16.mxu0 %v4995_v42 }
 0x663   : > { %v2621_v9 = vadd.bf16 %v2617_v57, %v2584_v7  ;;  %v4978_v7 = vld [vmem:[%s5754_s7] sm:$0xff]  }
 0x664   : > { %v2628_v13 = vmax.bf16 %v5132_v0, %v2620_v8 }
 0x665   : > { %v2562_v10 = vpop.f32.mrb[56].mxu0  ;;  %v2629_v11 = vmax.bf16 %v5132_v0, %v2621_v9  ;;  %4369 = vmatpush3.bf16.msra.mxu0 %v4996_v43 }
 0x666   : > { %v2564_v12 = vpop.f32.mrb[57].mxu0  ;;  %4370 = vmatprep.subr.bf16.mxu0 %v4997_v39 }
 0x667   : > { %v2566_v14 = vpop.f32.mrb[58].mxu0  ;;  %2869 = vmatprep.mubr.bf16.mxu0 %v2629_v11 }
 0x668   : > { %v2585_v15 = vpack.c.bf16 %v2566_v14, %v2562_v10  ;;  %v2568_v16 = vpop.f32.mrb[59].mxu0  ;;  %2870 = vmatmul.mubr.bf16.gmra.mrb[68].mxu0 %v2628_v13  ;;  %v4979_v10 = vld [vmem:[%s5754_s7 + $0x48] sm:$0xff]  }
 0x669   : > { %v2586_v18 = vpack.c.bf16 %v2568_v16, %v2564_v12  ;;  %4371 = vmatpush3.bf16.msra.mxu0 %v4998_v44 }
 0x66a   : > { %v2622_v19 = vadd.bf16 %v2610_v55, %v2585_v15  ;;  %4372 = vmatprep.subr.bf16.mxu0 %v4999_v45  ;;  %v4980_v15 = vld [vmem:[%s5754_s7 + $0x8] sm:$0xff]  }
 0x66b   : > { %v2623_v20 = vadd.bf16 %v2617_v57, %v2586_v18  ;;  %v4981_v18 = vld [vmem:[%s5754_s7 + $0x50] sm:$0xff]   ;;  %v4988_v45 = vld [vmem:[%s5754_s7 + $0x28] sm:$0xff]  }
 0x66c   : > { %v2630_v27 = vmax.bf16 %v5132_v0, %v2622_v19 }
 0x66d   : > { %v2572_v21 = vpop.f32.mrb[60].mxu0  ;;  %v2631_v23 = vmax.bf16 %v5132_v0, %v2623_v20  ;;  %4373 = vmatpush3.bf16.msra.mxu0 %v5000_v46 }
 0x66e   : > { %v2574_v26 = vpop.f32.mrb[61].mxu0  ;;  %4374 = vmatprep.subr.bf16.mxu0 %v5001_v47  ;;  %v4989_v47 = vld [vmem:[%s5754_s7 + $0x70] sm:$0xff]  }
 0x66f   : > { %v2576_v28 = vpop.f32.mrb[62].mxu0  ;;  %2879 = vmatprep.mubr.bf16.mxu0 %v2631_v23  ;;  %v4982_v23 = vld [vmem:[%s5754_s7 + $0x10] sm:$0xff]  }
 0x670   : > { %v2587_v29 = vpack.c.bf16 %v2576_v28, %v2572_v21  ;;  %v2578_v17 = vpop.f32.mrb[63].mxu0  ;;  %2880 = vmatmul.mubr.bf16.gmra.mrb[72].mxu0 %v2630_v27  ;;  %v4983_v28 = vld [vmem:[%s5754_s7 + $0x58] sm:$0xff]  }
 0x671   : > { %v2588_v30 = vpack.c.bf16 %v2578_v17, %v2574_v26  ;;  %4375 = vmatpush3.bf16.msra.mxu0 %v5002_v48 }
 0x672   : > { %v2624_v31 = vadd.bf16 %v2610_v55, %v2587_v29  ;;  %4376 = vmatprep.subr.bf16.mxu0 %v5003_v49  ;;  %v2922_v55 = vpack.c.bf16 %v2918_v53, %v2918_v53  ;;  %v4992_v53 = vld [vmem:[%s5754_s7 + $0x38] sm:$0xff]  }
 0x673   : > { %v2625_v33 = vadd.bf16 %v2617_v57, %v2588_v30 }
 0x674   : > { %v2632_v34 = vmax.bf16 %v5132_v0, %v2624_v31  ;;  %v2931_v57 = vpack.i.b16 %v2922_v55, %v2922_v55  ;;  %v5006_v55 = vld [vmem:[%s5752_s5 + $0x30] sm:$0xff]  }
 0x675   : > { %v2633_v24 = vmax.bf16 %v5132_v0, %v2625_v33  ;;  %4377 = vmatpush3.bf16.msra.mxu0 %v5004_v50  ;;  %v4984_v33 = vld [vmem:[%s5754_s7 + $0x18] sm:$0xff]   ;;  %v4990_v50 = vld [vmem:[%s5754_s7 + $0x30] sm:$0xff]  }
 0x676   : > { %v5542_v62 = vrot.slane %v2931_v57, %v5343_v22  ;;  %4378 = vmatprep.subr.bf16.mxu0 %v5005_v54  ;;  %v5008_v57 = vld [vmem:[%s5752_s5 + $0x38] sm:$0xff]  }
 0x677   : > { %2889 = vmatprep.mubr.bf16.mxu0 %v2633_v24 }
 0x678   : > { %2890 = vmatmul.mubr.bf16.gmra.mrb[76].mxu0 %v2632_v34  ;;  %v4985_v34 = vld [vmem:[%s5754_s7 + $0x60] sm:$0xff]  }
 0x679   : > { %4379 = vmatpush3.bf16.msra.mxu0 %v5006_v55 }
 0x67a   : > { %4380 = vmatprep.subr.bf16.mxu0 %v5007_v56 }
 0x67d   : > { %4381 = vmatpush3.bf16.msra.mxu0 %v5008_v57 }
 0x733   : > { %v2861_v58 = vpop.f32.mrb[64].mxu0 }
 0x734   : > { %v2863_v59 = vpop.f32.mrb[65].mxu0 }
 0x735   : > { %v2865_v61 = vpop.f32.mrb[66].mxu0 }
 0x736   : > { %v2900_v63 = vpack.c.bf16 %v2865_v61, %v2861_v58  ;;  %v2867_v1 = vpop.f32.mrb[67].mxu0  ;;  %v5009_v58 = vld [vmem:[%s5753_s6] sm:$0xff]  }
 0x737   : > { %v2901_v2 = vpack.c.bf16 %v2867_v1, %v2863_v59  ;;  %4458 = vmatprep.subr.bf16.mxu0 %v5009_v58  ;;  %v4278_v59 = vld [vmem:[%s5751_s4 + $0x10] ss:$8 sm:$0x3] }
 0x738   : > { %v2937_v3 = vadd.bf16 %v2929_v60, %v2900_v63  ;;  %v3233_v61 = vrot.slane %v4278_v59, %v5343_v22 }
 0x739   : > { %v2938_v4 = vadd.bf16 %v5542_v62, %v2901_v2 }
 0x73a   : > { %v5552_v8 = vmax.bf16 %v5132_v0, %v2937_v3  ;;  %v3240_v63 = vpack.c.bf16 %v3233_v61, %v3233_v61 }
 0x73b   : > { %v2871_v5 = vpop.f32.mrb[68].mxu0  ;;  %v5546_v6 = vmax.bf16 %v5132_v0, %v2938_v4 }
 0x73c   : > { %v2873_v9 = vpop.f32.mrb[69].mxu0  ;;  %v3243_v2 = vpack.i.b16 %v3240_v63, %v3240_v63 }
 0x73d   : > { %v2875_v11 = vpop.f32.mrb[70].mxu0  ;;  %3178 = vmatprep.mubr.bf16.mxu1 %v5546_v6 }
 0x73e   : > { %v2902_v12 = vpack.c.bf16 %v2875_v11, %v2871_v5  ;;  %v2877_v13 = vpop.f32.mrb[71].mxu0  ;;  %3179 = vmatmul.mubr.bf16.vlgmr.msra.gmra.mrb[48].mxu1 %v5552_v8 }
 0x73f   : > { %v2903_v14 = vpack.c.bf16 %v2877_v13, %v2873_v9  ;;  %4407 = vmatpush3.bf16.msra.mxu1 %v4978_v7 }
 0x740   : > { %v2939_v16 = vadd.bf16 %v2929_v60, %v2902_v12  ;;  %4408 = vmatprep.subr.bf16.mxu1 %v4979_v10 }
 0x741   : > { %v2940_v19 = vadd.bf16 %v5542_v62, %v2903_v14 }
 0x742   : > { %v2947_v27 = vmax.bf16 %v5132_v0, %v2939_v16 }
 0x743   : > { %v2881_v20 = vpop.f32.mrb[72].mxu0  ;;  %4409 = vmatpush3.bf16.msra.mxu1 %v4980_v15  ;;  %v2948_v21 = vmax.bf16 %v5132_v0, %v2940_v19  ;;  %v5011_v19 = vld [vmem:[%s5753_s6 + $0x10] sm:$0xff]  }
 0x744   : > { %v2883_v26 = vpop.f32.mrb[73].mxu0  ;;  %4410 = vmatprep.subr.bf16.mxu1 %v4981_v18 }
 0x745   : > { %v2885_v29 = vpop.f32.mrb[74].mxu0  ;;  %3188 = vmatprep.mubr.bf16.mxu1 %v2948_v21 }
 0x746   : > { %v2904_v17 = vpack.c.bf16 %v2885_v29, %v2881_v20  ;;  %v2887_v30 = vpop.f32.mrb[75].mxu0  ;;  %3189 = vmatmul.mubr.bf16.gmra.mrb[52].mxu1 %v2947_v27 }
 0x747   : > { %v2905_v31 = vpack.c.bf16 %v2887_v30, %v2883_v26  ;;  %4411 = vmatpush3.bf16.msra.mxu1 %v4982_v23 }
 0x748   : > { %v2941_v24 = vadd.bf16 %v2929_v60, %v2904_v17  ;;  %4412 = vmatprep.subr.bf16.mxu1 %v4983_v28 }
 0x749   : > { %v2942_v35 = vadd.bf16 %v5542_v62, %v2905_v31 }
 0x74a   : > { %v2949_v40 = vmax.bf16 %v5132_v0, %v2941_v24 }
 0x74b   : > { %v2891_v36 = vpop.f32.mrb[76].mxu0  ;;  %4413 = vmatpush3.bf16.msra.mxu1 %v4984_v33  ;;  %v2950_v37 = vmax.bf16 %v5132_v0, %v2942_v35 }
 0x74c   : > { %v2893_v38 = vpop.f32.mrb[77].mxu0  ;;  %4414 = vmatprep.subr.bf16.mxu1 %v4985_v34 }
 0x74d   : > { %v2895_v42 = vpop.f32.mrb[78].mxu0  ;;  %3198 = vmatprep.mubr.bf16.mxu1 %v2950_v37 }
 0x74e   : > { %v2906_v43 = vpack.c.bf16 %v2895_v42, %v2891_v36  ;;  %v2897_v39 = vpop.f32.mrb[79].mxu0  ;;  %3199 = vmatmul.mubr.bf16.gmra.mrb[56].mxu1 %v2949_v40 }
 0x74f   : > { %v2907_v44 = vpack.c.bf16 %v2897_v39, %v2893_v38  ;;  %4415 = vmatpush3.bf16.msra.mxu1 %v4986_v32 }
 0x750   : > { %v2943_v46 = vadd.bf16 %v2929_v60, %v2906_v43  ;;  %4416 = vmatprep.subr.bf16.mxu1 %v4987_v41  ;;  %v3237_v60 = vrot.slane %v4278_v59, %v5348_v25  ;;  %v5010_v25 = vld [vmem:[%s5753_s6 + $0x8] sm:$0xff]  }
 0x751   : > { %v2944_v48 = vadd.bf16 %v5542_v62, %v2907_v44 }
 0x752   : > { %v2951_v51 = vmax.bf16 %v5132_v0, %v2943_v46  ;;  %v3241_v62 = vpack.c.bf16 %v3237_v60, %v3237_v60 }
 0x753   : > { %4417 = vmatpush3.bf16.msra.mxu1 %v4988_v45  ;;  %v2952_v49 = vmax.bf16 %v5132_v0, %v2944_v48 }
 0x754   : > { %4418 = vmatprep.subr.bf16.mxu1 %v4989_v47  ;;  %v3250_v1 = vpack.i.b16 %v3241_v62, %v3241_v62 }
 0x755   : > { %3208 = vmatprep.mubr.bf16.mxu1 %v2952_v49 }
 0x756   : > { %3209 = vmatmul.mubr.bf16.gmra.mrb[60].mxu1 %v2951_v51 }
 0x757   : > { %4419 = vmatpush3.bf16.msra.mxu1 %v4990_v50  ;;  %3654 = vmatprep.mubr.bf16.mxu1 %v5546_v6  ;;  %v3255_v6 = vrot.slane %v3250_v1, %v5343_v22  ;;  %v5012_v1 = vld [vmem:[%s5753_s6 + $0x18] sm:$0xff]  }
 0x758   : > { %4420 = vmatprep.subr.bf16.mxu1 %v4991_v52 }
 0x75b   : > { %4421 = vmatpush3.bf16.msra.mxu1 %v4992_v53 }
 0x75e   : > { %3655 = vmatmul.mubr.bf16.vlgmr.msra.gmra.mrb[64].mxu1 %v5552_v8  ;;  %v3248_v8 = vrot.slane %v3243_v2, %v5343_v22  ;;  %v5013_v2 = vld [vmem:[%s5753_s6 + $0x20] sm:$0xff]  }
 0x75f   : > { %3662 = vmatprep.mubr.bf16.mxu1 %v2948_v21 }
 0x766   : > { %3663 = vmatmul.mubr.bf16.gmra.mrb[68].mxu1 %v2947_v27 }
 0x767   : > { %3670 = vmatprep.mubr.bf16.mxu1 %v2950_v37 }
 0x76e   : > { %3671 = vmatmul.mubr.bf16.gmra.mrb[72].mxu1 %v2949_v40 }
 0x76f   : > { %3678 = vmatprep.mubr.bf16.mxu1 %v2952_v49 }
 0x776   : > { %3679 = vmatmul.mubr.bf16.gmra.mrb[76].mxu1 %v2951_v51 }
 0x811   : > { %v3180_v3 = vpop.f32.mrb[48].mxu1 }
 0x812   : > { %v3182_v4 = vpop.f32.mrb[49].mxu1 }
 0x813   : > { %v3184_v5 = vpop.f32.mrb[50].mxu1 }
 0x814   : > { %v3219_v7 = vpack.c.bf16 %v3184_v5, %v3180_v3  ;;  %v3186_v9 = vpop.f32.mrb[51].mxu1  ;;  %v5014_v3 = vld [vmem:[%s5753_s6 + $0x28] sm:$0xff]   ;;  %v5016_v5 = vld [vmem:[%s5753_s6 + $0x38] sm:$0xff]  }
 0x815   : > { %v3220_v10 = vpack.c.bf16 %v3186_v9, %v3182_v4  ;;  %v5015_v4 = vld [vmem:[%s5753_s6 + $0x30] sm:$0xff]  }
 0x816   : > { %v3256_v12 = vadd.bf16 %v3248_v8, %v3219_v7 }
 0x817   : > { %v3257_v11 = vadd.bf16 %v3255_v6, %v3220_v10 }
 0x819   : > { %v3190_v13 = vpop.f32.mrb[52].mxu1  ;;  %3425 = vmatprep.mubr.bf16.mxu0 %v3257_v11 }
 0x81a   : > { %v3192_v14 = vpop.f32.mrb[53].mxu1  ;;  %3426 = vmatmul.mubr.bf16.vlgmr.msra.gmra.mrb[80].mxu0 %v3256_v12 }
 0x81b   : > { %v3194_v15 = vpop.f32.mrb[54].mxu1  ;;  %4459 = vmatpush3.bf16.msra.mxu0 %v5009_v58 }
 0x81c   : > { %v3221_v16 = vpack.c.bf16 %v3194_v15, %v3190_v13  ;;  %v3196_v18 = vpop.f32.mrb[55].mxu1  ;;  %4460 = vmatprep.subr.bf16.mxu0 %v5010_v25 }
 0x81d   : > { %v3222_v20 = vpack.c.bf16 %v3196_v18, %v3192_v14 }
 0x81e   : > { %v3258_v23 = vadd.bf16 %v3248_v8, %v3221_v16 }
 0x81f   : > { %v3259_v21 = vadd.bf16 %v3255_v6, %v3222_v20  ;;  %4461 = vmatpush3.bf16.msra.mxu0 %v5010_v25 }
 0x820   : > { %4462 = vmatprep.subr.bf16.mxu0 %v5011_v19 }
 0x821   : > { %v3200_v26 = vpop.f32.mrb[56].mxu1  ;;  %3433 = vmatprep.mubr.bf16.mxu0 %v3259_v21 }
 0x822   : > { %v3202_v27 = vpop.f32.mrb[57].mxu1  ;;  %3434 = vmatmul.mubr.bf16.gmra.mrb[84].mxu0 %v3258_v23 }
 0x823   : > { %v3204_v28 = vpop.f32.mrb[58].mxu1  ;;  %4463 = vmatpush3.bf16.msra.mxu0 %v5011_v19 }
 0x824   : > { %v3223_v29 = vpack.c.bf16 %v3204_v28, %v3200_v26  ;;  %v3206_v17 = vpop.f32.mrb[59].mxu1  ;;  %4464 = vmatprep.subr.bf16.mxu0 %v5012_v1 }
 0x825   : > { %v3224_v30 = vpack.c.bf16 %v3206_v17, %v3202_v27 }
 0x826   : > { %v3260_v33 = vadd.bf16 %v3248_v8, %v3223_v29 }
 0x827   : > { %v3261_v31 = vadd.bf16 %v3255_v6, %v3224_v30  ;;  %4465 = vmatpush3.bf16.msra.mxu0 %v5012_v1 }
 0x828   : > { %4466 = vmatprep.subr.bf16.mxu0 %v5013_v2 }
 0x829   : > { %v3210_v24 = vpop.f32.mrb[60].mxu1  ;;  %3441 = vmatprep.mubr.bf16.mxu0 %v3261_v31 }
 0x82a   : > { %v3212_v34 = vpop.f32.mrb[61].mxu1  ;;  %3442 = vmatmul.mubr.bf16.gmra.mrb[88].mxu0 %v3260_v33 }
 0x82b   : > { %v3214_v35 = vpop.f32.mrb[62].mxu1  ;;  %4467 = vmatpush3.bf16.msra.mxu0 %v5013_v2 }
 0x82c   : > { %v3225_v36 = vpack.c.bf16 %v3214_v35, %v3210_v24  ;;  %v3216_v37 = vpop.f32.mrb[63].mxu1  ;;  %4468 = vmatprep.subr.bf16.mxu0 %v5014_v3 }
 0x82d   : > { %v3226_v32 = vpack.c.bf16 %v3216_v37, %v3212_v34 }
 0x82e   : > { %v3262_v40 = vadd.bf16 %v3248_v8, %v3225_v36 }
 0x82f   : > { %v3263_v38 = vadd.bf16 %v3255_v6, %v3226_v32  ;;  %4469 = vmatpush3.bf16.msra.mxu0 %v5014_v3  ;;  %v3264_v6 = vld [vmem:[%s389_s24] sm:$0x1]  ;;  %s5049_s24 = sshll.u32 %s5133_s16, 4  ;;  %s5050_s24 = int_to_ptr.vmem [resolvable:$false] %s5049_s24 }
 0x830   : > { %4470 = vmatprep.subr.bf16.mxu0 %v5015_v4  ;;  %v3462_v7 = vpack.c.bf16 %v3264_v6, %v3264_v6  ;;  %s5051_s20 = scalar_lea.vmem %s5050_s24, 1024  ;;  %p5052_p1 = scmp.lt.s32.totalorder %s5692_s29, %s5050_s24 }
 0x831   : > { %3449 = vmatprep.mubr.bf16.mxu0 %v3263_v38  ;;  %v4422_v41 = vpop.f32.mrb[64].mxu1  ;;  %p5053_p3 = scmp.lt.s32.totalorder %s5051_s20, %s5045_s23 }
 0x832   : > { %3450 = vmatmul.mubr.bf16.gmra.mrb[92].mxu0 %v3262_v40  ;;  %v4423_v42 = vpop.f32.mrb[65].mxu1  ;;  %v3464_v9 = vpack.i.b16 %v3462_v7, %v3462_v7 }
 0x833   : > { %v5637_v43 = vadd.f32 %v4423_v42, %v4422_v41  ;;  %v4425_v39 = vpop.f32.mrb[66].mxu1  ;;  %4471 = vmatpush3.bf16.msra.mxu0 %v5015_v4  ;;  %p5054_p5 = por %p5053_p3, %p5052_p1 }
 0x834   : > { %v4426_v44 = vpop.f32.mrb[67].mxu1  ;;  %4472 = vmatprep.subr.bf16.mxu0 %v5016_v5  ;;  %v3469_v14 = vrot.slane %v3464_v9, %v5343_v22 }
 0x835   : > { %v5639_v45 = vadd.f32 %v4426_v44, %v4425_v39  ;;  %p5055_p6 = pnand %p5054_p5, %p5048_p13 }
 0x837   : > { %4473 = vmatpush3.bf16.msra.mxu0 %v5016_v5 }
 0x839   : > { %v4428_v46 = vpop.f32.mrb[68].mxu1 }
 0x83a   : > { %v4429_v47 = vpop.f32.mrb[69].mxu1 }
 0x83b   : > { %v5641_v48 = vadd.f32 %v4429_v47, %v4428_v46  ;;  %v4431_v49 = vpop.f32.mrb[70].mxu1 }
 0x83c   : > { %v4432_v50 = vpop.f32.mrb[71].mxu1 }
 0x83d   : > { %v5643_v51 = vadd.f32 %v4432_v50, %v4431_v49 }
 0x841   : > { %v4434_v52 = vpop.f32.mrb[72].mxu1 }
 0x842   : > { %v4435_v53 = vpop.f32.mrb[73].mxu1 }
 0x843   : > { %v5645_v54 = vadd.f32 %v4435_v53, %v4434_v52  ;;  %v4437_v55 = vpop.f32.mrb[74].mxu1  ;;  %v4319_v53 = vld [vmem:[%s5755_s8] ss:$0 sm:$0xff] }
 0x844   : > { %v4438_v56 = vpop.f32.mrb[75].mxu1 }
 0x845   : > { %v5647_v57 = vadd.f32 %v4438_v56, %v4437_v55 }
 0x849   : > { %v4440_v58 = vpop.f32.mrb[76].mxu1 }
 0x84a   : > { %v4441_v59 = vpop.f32.mrb[77].mxu1 }
 0x84b   : > { %v5649_v60 = vadd.f32 %v4441_v59, %v4440_v58  ;;  %v4443_v61 = vpop.f32.mrb[78].mxu1 }
 0x84c   : > { %v4444_v62 = vpop.f32.mrb[79].mxu1 }
 0x84d   : > { %v5651_v63 = vadd.f32 %v4444_v62, %v4443_v61 }
 0x8ed   : > { %v4382_v8 = vpop.f32.mrb[80].mxu0 }
 0x8ee   : > { %v4383_v10 = vpop.f32.mrb[81].mxu0 }
 0x8ef   : > { %v4384_v11 = vadd.f32 %v4383_v10, %v4382_v8  ;;  %v4385_v12 = vpop.f32.mrb[82].mxu0 }
 0x8f0   : > { %v4386_v25 = vpop.f32.mrb[83].mxu0 }
 0x8f1   : > { %v4387_v13 = vadd.f32 %v4386_v25, %v4385_v12 }
 0x8f3   : > { %v3458_v15 = vpack.c.bf16 %v4387_v13, %v4384_v11 }
 0x8f5   : > { %v3470_v16 = vadd.bf16 %v3469_v14, %v3458_v15  ;;  %v4388_v18 = vpop.f32.mrb[84].mxu0 }
 0x8f6   : > { %v4389_v19 = vpop.f32.mrb[85].mxu0 }
 0x8f7   : > { %v4390_v20 = vadd.f32 %v4389_v19, %v4388_v18  ;;  %v4391_v21 = vpop.f32.mrb[86].mxu0  ;;  %v3474_v23 = vmax.bf16 %v5132_v0, %v3470_v16 }
 0x8f8   : > { %v4392_v26 = vpop.f32.mrb[87].mxu0 }
 0x8f9   : > { %v4393_v27 = vadd.f32 %v4392_v26, %v4391_v21  ;;  %4474 = vmatprep.mubr.bf16.mxu0 %v3474_v23 }
 0x8fb   : > { %v3459_v28 = vpack.c.bf16 %v4393_v27, %v4390_v20 }
 0x8fd   : > { %v3471_v29 = vadd.bf16 %v3469_v14, %v3459_v28  ;;  %v4394_v17 = vpop.f32.mrb[88].mxu0 }
 0x8fe   : > { %v4395_v30 = vpop.f32.mrb[89].mxu0 }
 0x8ff   : > { %v3475_v31 = vmax.bf16 %v5132_v0, %v3471_v29  ;;  %v4396_v33 = vadd.f32 %v4395_v30, %v4394_v17  ;;  %v4397_v24 = vpop.f32.mrb[90].mxu0 }
 0x900   : > { %v4398_v22 = vpop.f32.mrb[91].mxu0 }
 0x901   : > { %v4399_v34 = vadd.f32 %v4398_v22, %v4397_v24  ;;  %4475 = vmatmul.mubr.bf16.vlgmr.msra.gmra.mrb[96].mxu0 %v3475_v31 }
 0x903   : > { %v3460_v35 = vpack.c.bf16 %v4399_v34, %v4396_v33 }
 0x905   : > { %v3472_v36 = vadd.bf16 %v3469_v14, %v3460_v35  ;;  %v4400_v37 = vpop.f32.mrb[92].mxu0 }
 0x906   : > { %v4401_v32 = vpop.f32.mrb[93].mxu0 }
 0x907   : > { %v4402_v38 = vadd.f32 %v4401_v32, %v4400_v37  ;;  %v4403_v40 = vpop.f32.mrb[94].mxu0  ;;  %v3476_v41 = vmax.bf16 %v5132_v0, %v3472_v36 }
 0x908   : > { %v4404_v42 = vpop.f32.mrb[95].mxu0 }
 0x909   : > { %v4405_v39 = vadd.f32 %v4404_v42, %v4403_v40  ;;  %4478 = vmatprep.mubr.bf16.mxu0 %v3476_v41 }
 0x90b   : > { %v3461_v44 = vpack.c.bf16 %v4405_v39, %v4402_v38 }
 0x90d   : > { %v3473_v46 = vadd.bf16 %v3469_v14, %v3461_v44 }
 0x90f   : > { %v3477_v47 = vmax.bf16 %v5132_v0, %v3473_v46 }
 0x911   : > { %4479 = vmatmul.mubr.bf16.gmra.mrb[100].mxu0 %v3477_v47 }
 0x9d4   : > { %v4476_v49 = vpop.f32.mrb[96].mxu0 }
 0x9d5   : > { %v3778_v50 = vadd.f32 %v4476_v49, %v5641_v48  ;;  %v3769_v52 = vpop.f32.mrb[97].mxu0 }
 0x9d6   : > { %v3770_v55 = vadd.f32 %v5637_v43, %v3769_v52  ;;  %v4477_v56 = vpop.f32.mrb[98].mxu0 }
 0x9d7   : > { %v3781_v58 = vadd.f32 %v4477_v56, %v5643_v51  ;;  %v3772_v59 = vpop.f32.mrb[99].mxu0  ;;  %v3809_v61 = vadd.f32 %v4319_v53, %v3778_v50 }
 0x9d8   : > { %v3773_v0 = vadd.f32 %v5639_v45, %v3772_v59  ;;  %v3807_v1 = vadd.f32 %v4319_v53, %v3770_v55 }
 0x9d9   : > { %v3810_v62 = vadd.f32 %v4319_v53, %v3781_v58 }
 0x9da   : > { %v3808_v48 = vadd.f32 %v4319_v53, %v3773_v0 }
 0x9db   : > { %v4351_v2 = vpack.c.bf16 %v3810_v62, %v3809_v61 }
 0x9dc   : > { %v4346_v3 = vpack.c.bf16 %v3808_v48, %v3807_v1 }
 0x9dd   : > { %4363 = vst [vmem:[%s376_s3 + $0x8] sm:$0xff] %v4351_v2  }
 0x9de   : > { %4347 = vst [vmem:[%s376_s3] sm:$0xff] %v4346_v3  }
 0x9e4   : > { %v4480_v4 = vpop.f32.mrb[100].mxu0 }
 0x9e5   : > { %v3794_v43 = vadd.f32 %v4480_v4, %v5649_v60  ;;  %v3785_v5 = vpop.f32.mrb[101].mxu0 }
 0x9e6   : > { %v3786_v6 = vadd.f32 %v5645_v54, %v3785_v5  ;;  %v4481_v51 = vpop.f32.mrb[102].mxu0 }
 0x9e7   : > { %v3797_v45 = vadd.f32 %v4481_v51, %v5651_v63  ;;  %v3788_v7 = vpop.f32.mrb[103].mxu0  ;;  %v3813_v9 = vadd.f32 %v4319_v53, %v3794_v43 }
 0x9e8   : > { %v3789_v8 = vadd.f32 %v5647_v57, %v3788_v7  ;;  %v3811_v11 = vadd.f32 %v4319_v53, %v3786_v6 }
 0x9e9   : > { %v3814_v10 = vadd.f32 %v4319_v53, %v3797_v45 }
 0x9ea   : > { %v3812_v12 = vadd.f32 %v4319_v53, %v3789_v8 }
 0x9eb   : > { %v4361_v54 = vpack.c.bf16 %v3814_v10, %v3813_v9 }
 0x9ec   : > { %v4356_v60 = vpack.c.bf16 %v3812_v12, %v3811_v11 }
 0x9ed   : > { %4365 = vst [vmem:[%s376_s3 + $0x18] sm:$0xff] %v4361_v54  }
 0x9ee   : > { %4364 = vst [vmem:[%s376_s3 + $0x10] sm:$0xff] %v4356_v60  }
 0x9ef   : > { %5058 = shalt.err (!%p5055_p6)
}
 0x9f0   : > { %s5059_s26 = scalar_lea.hbm %s5697_s27, 512  ;;  %s5063_s3 = scalar_lea.hbm %s5756_s9, 1024 }
 0x9f1   : > { %p5060_p7 = scmp.ne.s32.totalorder %s5697_s27, %s5059_s26  ;;  %p5064_p0 = scmp.lt.u32.totalorder %s5697_s27, %s5756_s9 }
 0x9f2   : > { %p5065_p2 = scmp.lt.u32.totalorder %s5063_s3, %s5059_s26  ;;  %p5067_p8 = scmp.lt.u32.totalorder %s5059_s26, %s5697_s27 }
 0x9f3   : > { %p5061_p9 = pnand %p5060_p7, %p5772_p10 }
 0x9f4   : > { %p5066_p4 = por %p5065_p2, %p5064_p0 }
 0x9f5   : > { %p5062_p12 = pneg %p5061_p9 }
 0x9f6   : > { %p5068_p11 = por %p5067_p8, %p5066_p4 }
 0x9f8   : > { %p5069_p13 = pnand %p5068_p11, %p5062_p12 }
 0x9fa   : > { %5072 = shalt.err (!%p5069_p13)
}
 0x9fb   : > { %s5134_s17 = smov 64   ;;  %s5135_s23 = smov 4  }
 0x9fc   : > { %4502 = dma.vmem_to_hbm [thread:$0]  (%p5772_p10), %s5692_s29, 512, %s5697_s27, %s5701_s12, %s5134_s17, %s5134_s17, %s5135_s23  }
 0x9fd PF: > { %p4514_p1 = scmp.ge.s32.totalorder %s5127_s14, 2  ;;  %s3886_s16 = sand.u32 1, %s5107_s30  }
 0x9fe   : > { %p5773_p3 = scmp.ne.s32.totalorder %s5765_s21, 0  ;;  %s3887_s24 = scalar_lea.sflag [#allocation4], %s3886_s16 }
 0xa00   : > { %p4509_p5 = pnand %p4514_p1, %p5773_p3 }
 0xa02   : > { %5102 = dma.done.wait (!%p4509_p5), %s3887_s24, 512  }
 0xa03   : > { %5104 = vsyncadd (!%p4509_p5), %s3887_s24, 4294966784  ;;  %s23_s14 = sadd.s32 1, %s5127_s14   ;;  %s5774_s19 = sld [smem:[#allocation8_spill]] }
 0xa04   : > { %p20_p6 = scmp.ge.s32.totalorder %s23_s14, 4   ;;  %s5775_s30 = smov %s5111_s10 }
 0xa05   : > { %s5776_s10 = smov %s5115_s11  ;;  %s5777_s11 = smov %s5239_s22 }
 0xa06   : > { %s5778_s12 = smov %s5123_s13  ;;  %22 = sbr.rel (!%p20_p6) target bundleno = 7 (0x7), region = 115 }
 0xa09   : > { %s5779_s13 = smov %s5774_s19 }
 0xa0d   :  { %3892 = vsyncpa [#allocation3], 1 }
 0xa0e   :  { %3894 = vsyncpa [#allocation3 + $0x1], 1 }
 0xa0f   :  { %3895 = vsyncpa [#allocation4], 1 }
 0xa10   :  { %3897 = vsyncpa [#allocation4 + $0x1], 1 }

</bundles_post_ra>
